<compile_context>
chip_gen: v7x
topology: tpu7x:2x2x1
jax: 0.10.0
libtpu: 0.0.40
codegen_flags: <defaults>
</compile_context>

<pallas_src>
import functools
import math

import jax
import jax.numpy as jnp
from jax.experimental import pallas as pl
from jax.experimental.pallas import tpu as pltpu


# ----------------------------------------------------------------------------
# Per-generation sizing (VMEM budget, tile defaults, TensorCore count)
# ----------------------------------------------------------------------------
def _vmem_capacity_bytes() -> int:
    try:
        info = pltpu.get_tpu_info()
        cap = getattr(info, "vmem_capacity_bytes", None)
        if cap:
            return int(cap)
    except Exception:
        pass
    return 64 * 1024 * 1024  # conservative fallback (v7x-sized)


_VMEM_CAP = _vmem_capacity_bytes()
_BIG_VMEM = _VMEM_CAP >= 96 * 1024 * 1024          # True on 128 MiB parts (v5e/v6e)
_VMEM_LIMIT_BYTES = max(32 * 1024 * 1024,
                        min(int(0.55 * _VMEM_CAP), 100 * 1024 * 1024))


def _n_tensorcores() -> int:
    try:
        kind = jax.devices()[0].device_kind.lower()
        if "v7" in kind:          # v7x: 2 TensorCores per chip share 'parallel' axes
            return 2
    except Exception:
        pass
    return 1


_MIN_M_BLOCKS = _n_tensorcores()


def _fit_tile(dim: int, pref: int, granule: int, min_blocks: int = 1) -> int:
    """Largest tile <= `pref` that divides `dim`, is a multiple of `granule`, and
    (when feasible) leaves at least `min_blocks` blocks; falls back to full dim."""
    if min_blocks > 1:
        cap = (dim // (min_blocks * granule)) * granule
        if cap >= granule:
            pref = min(pref, cap)
    if dim <= pref:
        return dim
    t = (pref // granule) * granule
    while t >= granule:
        if dim % t == 0:
            return t
        t -= granule
    return dim


# ----------------------------------------------------------------------------
# Kernel 1: fused RMSNorm + QKV projection, three direct outputs.
#   grid (M/tm, column tiles); the normed x tile is computed once per M tile
#   (g == 0) and cached in VMEM across the column-tile axis.
# ----------------------------------------------------------------------------
def _rmsnorm_qkv_kernel(x_ref, wq_ref, wk_ref, wv_ref, g_ref,
                        q_ref, k_ref, v_ref, xn_ref, *, eps):
    g = pl.program_id(1)

    @pl.when(g == 0)
    def _():
        xf = x_ref[...].astype(jnp.float32)
        var = jnp.mean(xf * xf, axis=-1, keepdims=True)
        normed = (xf * jax.lax.rsqrt(var + eps)).astype(x_ref.dtype)
        xn_ref[...] = (normed * g_ref[...]).astype(xn_ref.dtype)

    xn = xn_ref[...]
    q_ref[...] = jnp.dot(xn, wq_ref[...],
                         preferred_element_type=jnp.float32).astype(q_ref.dtype)
    k_ref[...] = jnp.dot(xn, wk_ref[...],
                         preferred_element_type=jnp.float32).astype(k_ref.dtype)
    v_ref[...] = jnp.dot(xn, wv_ref[...],
                         preferred_element_type=jnp.float32).astype(v_ref.dtype)


def rmsnorm_qkv(x, wq, wk, wv, gamma, *, eps=1e-6, n_heads, kv_heads, tm=None):
    M, D = x.shape
    nq = wq.shape[1]
    nk = wk.shape[1]
    assert wq.shape[0] == D and wk.shape == (D, nk) and wv.shape == (D, nk)
    head_dim = nq // n_heads
    n_rep = n_heads // kv_heads
    qg = n_rep * head_dim

    # Column tiling only when every block keeps a lane-dense (128-multiple) width;
    # otherwise compute all QKV columns in one step (full-dim blocks are always legal).
    if kv_heads > 1 and qg % 128 == 0 and head_dim % 128 == 0:
        ncol, q_bn, kv_bn = kv_heads, qg, head_dim
    else:
        ncol, q_bn, kv_bn = 1, nq, nk

    tm_pref = tm or (512 if _BIG_VMEM else 256)
    tm = _fit_tile(M, tm_pref, 8, min_blocks=_MIN_M_BLOCKS)
    grid = (M // tm, ncol)
    kernel = functools.partial(_rmsnorm_qkv_kernel, eps=eps)

    return pl.pallas_call(
        kernel,
        out_shape=(jax.ShapeDtypeStruct((M, nq), x.dtype),
                   jax.ShapeDtypeStruct((M, nk), x.dtype),
                   jax.ShapeDtypeStruct((M, nk), x.dtype)),
        grid=grid,
        in_specs=[
            pl.BlockSpec((tm, D), lambda i, g: (i, 0)),
            pl.BlockSpec((D, q_bn), lambda i, g: (0, g)),
            pl.BlockSpec((D, kv_bn), lambda i, g: (0, g)),
            pl.BlockSpec((D, kv_bn), lambda i, g: (0, g)),
            pl.BlockSpec((1, D), lambda i, g: (0, 0)),
        ],
        out_specs=(
            pl.BlockSpec((tm, q_bn), lambda i, g: (i, g)),
            pl.BlockSpec((tm, kv_bn), lambda i, g: (i, g)),
            pl.BlockSpec((tm, kv_bn), lambda i, g: (i, g)),
        ),
        scratch_shapes=[pltpu.VMEM((tm, D), x.dtype)],
        compiler_params=pltpu.CompilerParams(
            dimension_semantics=("parallel", "arbitrary"),
            vmem_limit_bytes=_VMEM_LIMIT_BYTES,
        ),
    )(x, wq, wk, wv, gamma)


# ----------------------------------------------------------------------------
# Kernel 2: flash-style GQA attention on the (B, T, H*hd) projection layout.
#   grid (B, Tq tiles, Tkv tiles); KV axis last + 'arbitrary'; all query heads of a
#   q tile are processed per grid step (K/V DMA amortised over the whole GQA group).
#   The 1/sqrt(hd) scale is pre-folded into wq, so q arrives already scaled.
#   NOTE: per the spec's repeat_kv code, query head h uses kv head (h % kv_heads).
# ----------------------------------------------------------------------------
def _flash_attn_kernel(q_ref, k_ref, v_ref, o_ref, m_ref, l_ref, acc_ref,
                       *, n_heads, kv_heads, head_dim, exp_dtype):
    ki = pl.program_id(2)

    @pl.when(ki == 0)
    def _():
        m_ref[...] = jnp.full(m_ref.shape, -jnp.inf, dtype=m_ref.dtype)
        l_ref[...] = jnp.zeros(l_ref.shape, dtype=l_ref.dtype)
        acc_ref[...] = jnp.zeros(acc_ref.shape, dtype=acc_ref.dtype)

    q = q_ref[0]   # (tq,  n_heads  * head_dim)  -- already scaled by 1/sqrt(hd)
    k = k_ref[0]   # (tkv, kv_heads * head_dim)
    v = v_ref[0]   # (tkv, kv_heads * head_dim)

    for h in range(n_heads):
        g = h % kv_heads                      # spec's repeat_kv: tile, not interleave
        hs, he = h * head_dim, (h + 1) * head_dim
        gs, ge = g * head_dim, (g + 1) * head_dim

        qh = q[:, hs:he]
        kg = k[:, gs:ge]
        vg = v[:, gs:ge]

        # scores = qh @ kg^T without materialising a transpose.
        s = jax.lax.dot_general(
            qh, kg,
            dimension_numbers=(((1,), (1,)), ((), ())),
            preferred_element_type=jnp.float32)                 # (tq, tkv) f32

        m_prev = m_ref[h]                                       # (tq, 1)
        m_new = jnp.maximum(m_prev, jnp.max(s, axis=-1, keepdims=True))
        alpha = jnp.exp(m_prev - m_new)                         # tiny, keep f32
        p = jnp.exp((s - m_new).astype(exp_dtype))              # big exp: bf16 on bf16 runs
        l_ref[h] = alpha * l_ref[h] + jnp.sum(
            p.astype(jnp.float32), axis=-1, keepdims=True)

        pv = jax.lax.dot_general(
            p.astype(v.dtype), vg,
            dimension_numbers=(((1,), (0,)), ((), ())),
            preferred_element_type=jnp.float32)                 # (tq, hd) f32
        acc_ref[:, hs:he] = alpha * acc_ref[:, hs:he] + pv
        m_ref[h] = m_new

    @pl.when(ki == pl.num_programs(2) - 1)
    def _():
        # Fused finalize: normalize and store each head's slice directly (no extra
        # full read-modify-write pass over the f32 accumulator).
        for h in range(n_heads):
            hs, he = h * head_dim, (h + 1) * head_dim
            inv = pl.reciprocal(l_ref[h], approx=True)          # EUP, off the VPU path
            o_ref[0, :, hs:he] = (acc_ref[:, hs:he] * inv).astype(o_ref.dtype)


def flash_gqa_attention(q, k, v, n_heads, kv_heads, *, tq=256, tkv=512):
    B, T, NQ = q.shape
    _, _, NK = k.shape
    head_dim = NQ // n_heads
    assert NK == kv_heads * head_dim and v.shape == k.shape
    tq = _fit_tile(T, tq, 8)
    tkv = _fit_tile(T, tkv, 8)
    grid = (B, T // tq, T // tkv)
    exp_dtype = jnp.bfloat16 if q.dtype == jnp.bfloat16 else jnp.float32
    kernel = functools.partial(
        _flash_attn_kernel, n_heads=n_heads, kv_heads=kv_heads,
        head_dim=head_dim, exp_dtype=exp_dtype)
    return pl.pallas_call(
        kernel,
        out_shape=jax.ShapeDtypeStruct((B, T, NQ), q.dtype),
        grid=grid,
        in_specs=[
            pl.BlockSpec((1, tq, NQ), lambda b, qi, ki: (b, qi, 0)),
            pl.BlockSpec((1, tkv, NK), lambda b, qi, ki: (b, ki, 0)),
            pl.BlockSpec((1, tkv, NK), lambda b, qi, ki: (b, ki, 0)),
        ],
        out_specs=pl.BlockSpec((1, tq, NQ), lambda b, qi, ki: (b, qi, 0)),
        scratch_shapes=[
            pltpu.VMEM((n_heads, tq, 1), jnp.float32),   # m (running max)
            pltpu.VMEM((n_heads, tq, 1), jnp.float32),   # l (running denom)
            pltpu.VMEM((tq, NQ), jnp.float32),           # acc (unnormalised out)
        ],
        compiler_params=pltpu.CompilerParams(
            dimension_semantics=("parallel", "parallel", "arbitrary"),
            vmem_limit_bytes=_VMEM_LIMIT_BYTES,
        ),
    )(q, k, v)


# ----------------------------------------------------------------------------
# Kernel 3: tiled matmul with f32 accumulator + fused residual add (wo proj).
# ----------------------------------------------------------------------------
def _matmul_residual_kernel(a_ref, b_ref, r_ref, o_ref, acc_ref):
    kidx = pl.program_id(2)

    @pl.when(kidx == 0)
    def _():
        acc_ref[...] = jnp.zeros(acc_ref.shape, dtype=acc_ref.dtype)

    acc_ref[...] += jnp.dot(a_ref[...], b_ref[...],
                            preferred_element_type=jnp.float32)

    @pl.when(kidx == pl.num_programs(2) - 1)
    def _():
        o_ref[...] = (acc_ref[...] + r_ref[...].astype(jnp.float32)).astype(o_ref.dtype)


def matmul_residual(a, b, res, *, tm=None, tn=None, tk=512):
    M, K = a.shape
    K2, N = b.shape
    assert K == K2 and res.shape == (M, N)
    tm_pref = tm or (512 if _BIG_VMEM else 256)
    tn_pref = tn or (512 if _BIG_VMEM else 256)
    tm = _fit_tile(M, tm_pref, 8, min_blocks=_MIN_M_BLOCKS)
    tn = _fit_tile(N, tn_pref, 128)
    tk = _fit_tile(K, tk, 128)
    grid = (M // tm, N // tn, K // tk)
    return pl.pallas_call(
        _matmul_residual_kernel,
        out_shape=jax.ShapeDtypeStruct((M, N), a.dtype),
        grid=grid,
        in_specs=[
            pl.BlockSpec((tm, tk), lambda i, j, k: (i, k)),
            pl.BlockSpec((tk, tn), lambda i, j, k: (k, j)),
            pl.BlockSpec((tm, tn), lambda i, j, k: (i, j)),
        ],
        out_specs=pl.BlockSpec((tm, tn), lambda i, j, k: (i, j)),
        scratch_shapes=[pltpu.VMEM((tm, tn), jnp.float32)],
        compiler_params=pltpu.CompilerParams(
            dimension_semantics=("parallel", "parallel", "arbitrary"),
            vmem_limit_bytes=_VMEM_LIMIT_BYTES,
        ),
    )(a, b, res)


# ----------------------------------------------------------------------------
# Kernel 4: fused RMSNorm + SwiGLU FFN + residual.
#   grid (M/tm, hidden/th); the hidden dim is the reduction axis of the second
#   matmul, accumulated in f32 VMEM scratch.  The normed input is cached per M tile.
# ----------------------------------------------------------------------------
def _ffn_kernel(h_ref, w1_ref, w3_ref, w2_ref, g_ref, o_ref, hn_ref, acc_ref, *, eps):
    j = pl.program_id(1)

    @pl.when(j == 0)
    def _():
        hf = h_ref[...].astype(jnp.float32)
        var = jnp.mean(hf * hf, axis=-1, keepdims=True)
        normed = (hf * jax.lax.rsqrt(var + eps)).astype(h_ref.dtype)
        hn_ref[...] = (normed * g_ref[...]).astype(hn_ref.dtype)
        acc_ref[...] = jnp.zeros(acc_ref.shape, dtype=acc_ref.dtype)

    hn = hn_ref[...]
    a = jnp.dot(hn, w1_ref[...], preferred_element_type=jnp.float32)   # (tm, th)
    b = jnp.dot(hn, w3_ref[...], preferred_element_type=jnp.float32)   # (tm, th)
    # silu(a) * b -- reciprocal routed to the EUP (otherwise idle in this kernel).
    sig = pl.reciprocal(1.0 + jnp.exp(-a), approx=True)
    gated = (a * sig) * b
    acc_ref[...] += jnp.dot(gated.astype(w2_ref.dtype), w2_ref[...],
                            preferred_element_type=jnp.float32)

    @pl.when(j == pl.num_programs(1) - 1)
    def _():
        o_ref[...] = (h_ref[...].astype(jnp.float32) + acc_ref[...]).astype(o_ref.dtype)


def ffn_block(h, w1, w3, w2, gamma, *, eps=1e-6, tm=256, th=None):
    M, D = h.shape
    D2, Hd = w1.shape
    assert D == D2 and w3.shape == (D, Hd) and w2.shape == (Hd, D)
    th_pref = th or (512 if _BIG_VMEM else 256)
    tm = _fit_tile(M, tm, 8, min_blocks=_MIN_M_BLOCKS)
    th = _fit_tile(Hd, th_pref, 128)
    grid = (M // tm, Hd // th)
    kernel = functools.partial(_ffn_kernel, eps=eps)
    return pl.pallas_call(
        kernel,
        out_shape=jax.ShapeDtypeStruct((M, D), h.dtype),
        grid=grid,
        in_specs=[
            pl.BlockSpec((tm, D), lambda i, j: (i, 0)),
            pl.BlockSpec((D, th), lambda i, j: (0, j)),
            pl.BlockSpec((D, th), lambda i, j: (0, j)),
            pl.BlockSpec((th, D), lambda i, j: (j, 0)),
            pl.BlockSpec((1, D), lambda i, j: (0, 0)),
        ],
        out_specs=pl.BlockSpec((tm, D), lambda i, j: (i, 0)),
        scratch_shapes=[pltpu.VMEM((tm, D), h.dtype),
                        pltpu.VMEM((tm, D), jnp.float32)],
        compiler_params=pltpu.CompilerParams(
            dimension_semantics=("parallel", "arbitrary"),
            vmem_limit_bytes=_VMEM_LIMIT_BYTES,
        ),
    )(h, w1, w3, w2, gamma)


# ----------------------------------------------------------------------------
# One-time (outside jit) parameter prep: fold 1/sqrt(head_dim) into wq columns.
# ----------------------------------------------------------------------------
def prepare_block_params(params, n_heads):
    head_dim = params["wq"].shape[1] // n_heads
    p = dict(params)
    p["wq"] = (params["wq"].astype(jnp.float32)
               * (1.0 / math.sqrt(head_dim))).astype(params["wq"].dtype)
    return p


# ----------------------------------------------------------------------------
# Full TransformerBlock forward (glue in plain JAX, hot paths in Pallas)
# ----------------------------------------------------------------------------
def transformer_block_forward(x, p, *, n_heads, kv_heads, eps):
    B, T, D = x.shape
    M = B * T
    head_dim = D // n_heads
    nq = n_heads * head_dim
    nk = kv_heads * head_dim

    x2 = x.reshape(M, D)

    # --- h = x + Attention(attention_norm(x)) ---
    q2, k2, v2 = rmsnorm_qkv(
        x2, p["wq"], p["wk"], p["wv"], p["attn_norm"].reshape(1, D),
        eps=eps, n_heads=n_heads, kv_heads=kv_heads)

    attn = flash_gqa_attention(
        q2.reshape(B, T, nq), k2.reshape(B, T, nk), v2.reshape(B, T, nk),
        n_heads, kv_heads)                                        # (B, T, H*hd)
    h2 = matmul_residual(attn.reshape(M, nq), p["wo"], x2)        # x + wo(attn)

    # --- out = h + FFN(ffn_norm(h)) ---
    out2 = ffn_block(h2, p["w1"], p["w3"], p["w2"],
                     p["ffn_norm"].reshape(1, D), eps=eps)
    return out2.reshape(B, T, D)


# ----------------------------------------------------------------------------
# Pure-JAX reference mirroring the PyTorch forward exactly (for validation)
# ----------------------------------------------------------------------------
def _rmsnorm_ref(x, w, eps):
    xf = x.astype(jnp.float32)
    n = xf * jax.lax.rsqrt(jnp.mean(xf * xf, axis=-1, keepdims=True) + eps)
    return n.astype(x.dtype) * w


def _repeat_kv_ref(x, n_rep):
    # Literal translation of the spec's repeat_kv (None inserted BEFORE the kv-head
    # axis): output head j uses kv head (j % n_kv_heads).
    B, T, G, hd = x.shape
    if n_rep == 1:
        return x
    x = jnp.broadcast_to(x[:, :, None, :, :], (B, T, n_rep, G, hd))
    return x.reshape(B, T, n_rep * G, hd)


def _attention_ref(x, p, n_heads, kv_heads):
    B, T, D = x.shape
    head_dim = D // n_heads
    n_rep = n_heads // kv_heads
    xq = (x @ p["wq"]).reshape(B, T, n_heads, head_dim)
    xk = (x @ p["wk"]).reshape(B, T, kv_heads, head_dim)
    xv = (x @ p["wv"]).reshape(B, T, kv_heads, head_dim)
    keys = _repeat_kv_ref(xk, n_rep)
    values = _repeat_kv_ref(xv, n_rep)
    q = jnp.transpose(xq, (0, 2, 1, 3))
    kk = jnp.transpose(keys, (0, 2, 1, 3))
    vv = jnp.transpose(values, (0, 2, 1, 3))
    scores = jnp.einsum("bhqd,bhkd->bhqk", q, kk) / math.sqrt(head_dim)
    scores = jax.nn.softmax(scores.astype(jnp.float32), axis=-1).astype(q.dtype)
    out = jnp.einsum("bhqk,bhkd->bhqd", scores, vv)
    out = jnp.transpose(out, (0, 2, 1, 3)).reshape(B, T, -1)
    return out @ p["wo"]


def transformer_block_reference(x, p, *, n_heads, kv_heads, eps):
    h = x + _attention_ref(_rmsnorm_ref(x, p["attn_norm"], eps), p, n_heads, kv_heads)
    n2 = _rmsnorm_ref(h, p["ffn_norm"], eps)
    ff = (jax.nn.silu(n2 @ p["w1"]) * (n2 @ p["w3"])) @ p["w2"]
    return h + ff


if __name__ == "__main__":
    # Small config consistent with the module.
    B, T, D = 2, 8, 32
    n_heads, kv_heads = 4, 2
    head_dim = D // n_heads
    multiple_of = 32
    norm_eps = 1e-6
    hidden = int(7 * (4 * D) / 8)
    hidden = multiple_of * ((hidden + multiple_of - 1) // multiple_of)   # 128

    key = jax.random.PRNGKey(0)
    ks = jax.random.split(key, 10)
    x = jax.random.normal(ks[0], (B, T, D), dtype=jnp.float32)

    def linear_w(k, din, dout):
        # nn.Linear(din, dout) weight is (dout, din); we store the transpose.
        s = 1.0 / math.sqrt(din)
        return jax.random.uniform(k, (din, dout), jnp.float32, -s, s)

    params = {
        "wq": linear_w(ks[1], D, n_heads * head_dim),
        "wk": linear_w(ks[2], D, kv_heads * head_dim),
        "wv": linear_w(ks[3], D, kv_heads * head_dim),
        "wo": linear_w(ks[4], n_heads * head_dim, D),
        "w1": linear_w(ks[5], D, hidden),
        "w3": linear_w(ks[6], D, hidden),
        "w2": linear_w(ks[7], hidden, D),
        "attn_norm": 1.0 + 0.1 * jax.random.normal(ks[8], (D,), jnp.float32),
        "ffn_norm": 1.0 + 0.1 * jax.random.normal(ks[9], (D,), jnp.float32),
    }

    # One-time parameter prep (scale folding) happens OUTSIDE the jitted forward.
    kparams = prepare_block_params(params, n_heads)

    fwd = jax.jit(functools.partial(
        transformer_block_forward, n_heads=n_heads, kv_heads=kv_heads, eps=norm_eps))

    y = fwd(x, kparams)
    y = jax.block_until_ready(y)

    y_ref = transformer_block_reference(
        x, params, n_heads=n_heads, kv_heads=kv_heads, eps=norm_eps)

    assert y.shape == (B, T, D)
    # Tolerance accounts for the approximate (EUP) reciprocals in softmax / sigmoid.
    assert jnp.allclose(y, y_ref, atol=5e-3, rtol=5e-3), "mismatch vs reference"

    print("KERNEL_OK")
</pallas_src>

<mosaic_0001>
module attributes {stable_mosaic.version = 11 : i64} {
  func.func @_rmsnorm_qkv_kernel(%arg0: i32, %arg1: i32, %arg2: memref<16x32xf32, #tpu.memory_space<vmem>>, %arg3: memref<32x32xf32, #tpu.memory_space<vmem>>, %arg4: memref<32x16xf32, #tpu.memory_space<vmem>>, %arg5: memref<32x16xf32, #tpu.memory_space<vmem>>, %arg6: memref<1x32xf32, #tpu.memory_space<vmem>>, %arg7: memref<16x32xf32, #tpu.memory_space<vmem>>, %arg8: memref<16x16xf32, #tpu.memory_space<vmem>>, %arg9: memref<16x16xf32, #tpu.memory_space<vmem>>, %arg10: memref<16x32xf32, #tpu.memory_space<vmem>>) attributes {dimension_semantics = [#tpu.dimension_semantics<parallel>, #tpu.dimension_semantics<arbitrary>], iteration_bounds = array<i64: 1, 1>, scalar_prefetch = 0 : i64, scratch_operands = 1 : i64, tpu.core_type = #tpu.core_type<tc>, window_params = [{transform_indices = @transform_0, window_bounds = array<i64: 16, 32>}, {transform_indices = @transform_1, window_bounds = array<i64: 32, 32>}, {transform_indices = @transform_2, window_bounds = array<i64: 32, 16>}, {transform_indices = @transform_3, window_bounds = array<i64: 32, 16>}, {pipeline_mode = #tpu.pipeline_mode<synchronous>, transform_indices = @transform_4, window_bounds = array<i64: 1, 32>}, {transform_indices = @transform_5, window_bounds = array<i64: 16, 32>}, {transform_indices = @transform_6, window_bounds = array<i64: 16, 16>}, {transform_indices = @transform_7, window_bounds = array<i64: 16, 16>}]} {
    %c0_i32 = arith.constant 0 : i32
    %0 = arith.cmpi eq, %arg1, %c0_i32 : i32
    %1 = arith.extui %0 : i1 to i32
    %c0_i32_0 = arith.constant 0 : i32
    %2 = arith.cmpi ne, %1, %c0_i32_0 : i32
    scf.if %2 {
      %c0_16 = arith.constant 0 : index
      %c0_17 = arith.constant 0 : index
      %13 = vector.load %arg2[%c0_16, %c0_17] : memref<16x32xf32, #tpu.memory_space<vmem>>, vector<16x32xf32>
      %14 = arith.mulf %13, %13 : vector<16x32xf32>
      %cst_18 = arith.constant dense<0.000000e+00> : vector<16xf32>
      %15 = vector.multi_reduction <add>, %14, %cst_18 [1] : vector<16x32xf32> to vector<16xf32>
      %16 = vector.shape_cast %15 : vector<16xf32> to vector<16x1xf32>
      %cst_19 = arith.constant 3.200000e+01 : f32
      %17 = vector.broadcast %cst_19 : f32 to vector<16x1xf32>
      %18 = arith.divf %16, %17 : vector<16x1xf32>
      %cst_20 = arith.constant 9.99999997E-7 : f32
      %19 = vector.broadcast %cst_20 : f32 to vector<16x1xf32>
      %20 = arith.addf %18, %19 : vector<16x1xf32>
      %21 = math.rsqrt %20 : vector<16x1xf32>
      %22 = vector.broadcast %21 : vector<16x1xf32> to vector<16x32xf32>
      %23 = arith.mulf %13, %22 : vector<16x32xf32>
      %c0_21 = arith.constant 0 : index
      %c0_22 = arith.constant 0 : index
      %24 = vector.load %arg6[%c0_21, %c0_22] : memref<1x32xf32, #tpu.memory_space<vmem>>, vector<1x32xf32>
      %25 = vector.broadcast %24 : vector<1x32xf32> to vector<16x32xf32>
      %26 = arith.mulf %23, %25 : vector<16x32xf32>
      %c0_23 = arith.constant 0 : index
      %c0_24 = arith.constant 0 : index
      %27 = vector.load %arg10[%c0_23, %c0_24] : memref<16x32xf32, #tpu.memory_space<vmem>>, vector<16x32xf32>
      tpu.vector_store %arg10[%c0_23, %c0_24], %26 {strides = array<i32>} : memref<16x32xf32, #tpu.memory_space<vmem>>, vector<16x32xf32>,
    } else {
    }
    %c0 = arith.constant 0 : index
    %c0_1 = arith.constant 0 : index
    %3 = vector.load %arg10[%c0, %c0_1] : memref<16x32xf32, #tpu.memory_space<vmem>>, vector<16x32xf32>
    %c0_2 = arith.constant 0 : index
    %c0_3 = arith.constant 0 : index
    %4 = vector.load %arg3[%c0_2, %c0_3] : memref<32x32xf32, #tpu.memory_space<vmem>>, vector<32x32xf32>
    %cst = arith.constant dense<0.000000e+00> : vector<16x32xf32>
    %5 = tpu.matmul %3, %4, %cst {dimension_numbers = #tpu.dot_dimension_numbers<[1], [0], [0], [1], [0, 0, 1, 1], [], []>} : vector<16x32xf32>, vector<32x32xf32>, vector<16x32xf32> -> vector<16x32xf32>
    %c0_4 = arith.constant 0 : index
    %c0_5 = arith.constant 0 : index
    %6 = vector.load %arg7[%c0_4, %c0_5] : memref<16x32xf32, #tpu.memory_space<vmem>>, vector<16x32xf32>
    tpu.vector_store %arg7[%c0_4, %c0_5], %5 {strides = array<i32>} : memref<16x32xf32, #tpu.memory_space<vmem>>, vector<16x32xf32>,
    %c0_6 = arith.constant 0 : index
    %c0_7 = arith.constant 0 : index
    %7 = vector.load %arg4[%c0_6, %c0_7] : memref<32x16xf32, #tpu.memory_space<vmem>>, vector<32x16xf32>
    %cst_8 = arith.constant dense<0.000000e+00> : vector<16x16xf32>
    %8 = tpu.matmul %3, %7, %cst_8 {dimension_numbers = #tpu.dot_dimension_numbers<[1], [0], [0], [1], [0, 0, 1, 1], [], []>} : vector<16x32xf32>, vector<32x16xf32>, vector<16x16xf32> -> vector<16x16xf32>
    %c0_9 = arith.constant 0 : index
    %c0_10 = arith.constant 0 : index
    %9 = vector.load %arg8[%c0_9, %c0_10] : memref<16x16xf32, #tpu.memory_space<vmem>>, vector<16x16xf32>
    tpu.vector_store %arg8[%c0_9, %c0_10], %8 {strides = array<i32>} : memref<16x16xf32, #tpu.memory_space<vmem>>, vector<16x16xf32>,
    %c0_11 = arith.constant 0 : index
    %c0_12 = arith.constant 0 : index
    %10 = vector.load %arg5[%c0_11, %c0_12] : memref<32x16xf32, #tpu.memory_space<vmem>>, vector<32x16xf32>
    %cst_13 = arith.constant dense<0.000000e+00> : vector<16x16xf32>
    %11 = tpu.matmul %3, %10, %cst_13 {dimension_numbers = #tpu.dot_dimension_numbers<[1], [0], [0], [1], [0, 0, 1, 1], [], []>} : vector<16x32xf32>, vector<32x16xf32>, vector<16x16xf32> -> vector<16x16xf32>
    %c0_14 = arith.constant 0 : index
    %c0_15 = arith.constant 0 : index
    %12 = vector.load %arg9[%c0_14, %c0_15] : memref<16x16xf32, #tpu.memory_space<vmem>>, vector<16x16xf32>
    tpu.vector_store %arg9[%c0_14, %c0_15], %11 {strides = array<i32>} : memref<16x16xf32, #tpu.memory_space<vmem>>, vector<16x16xf32>,
    return
  }
  func.func @transform_0(%arg0: i32, %arg1: i32) -> (i32, i32) {
    %c0_i32 = arith.constant 0 : i32
    %c0_i32_0 = arith.constant 0 : i32
    return %arg0, %c0_i32 : i32, i32
  }
  func.func @transform_1(%arg0: i32, %arg1: i32) -> (i32, i32) {
    %c0_i32 = arith.constant 0 : i32
    %c0_i32_0 = arith.constant 0 : i32
    return %c0_i32, %arg1 : i32, i32
  }
  func.func @transform_2(%arg0: i32, %arg1: i32) -> (i32, i32) {
    %c0_i32 = arith.constant 0 : i32
    %c0_i32_0 = arith.constant 0 : i32
    return %c0_i32, %arg1 : i32, i32
  }
  func.func @transform_3(%arg0: i32, %arg1: i32) -> (i32, i32) {
    %c0_i32 = arith.constant 0 : i32
    %c0_i32_0 = arith.constant 0 : i32
    return %c0_i32, %arg1 : i32, i32
  }
  func.func @transform_4(%arg0: i32, %arg1: i32) -> (i32, i32) {
    %c0_i32 = arith.constant 0 : i32
    %c0_i32_0 = arith.constant 0 : i32
    %c0_i32_1 = arith.constant 0 : i32
    return %c0_i32, %c0_i32_0 : i32, i32
  }
  func.func @transform_5(%arg0: i32, %arg1: i32) -> (i32, i32) {
    %c0_i32 = arith.constant 0 : i32
    return %arg0, %arg1 : i32, i32
  }
  func.func @transform_6(%arg0: i32, %arg1: i32) -> (i32, i32) {
    %c0_i32 = arith.constant 0 : i32
    return %arg0, %arg1 : i32, i32
  }
  func.func @transform_7(%arg0: i32, %arg1: i32) -> (i32, i32) {
    %c0_i32 = arith.constant 0 : i32
    return %arg0, %arg1 : i32, i32
  }
}

module attributes {stable_mosaic.version = 11 : i64} {
  func.func @_matmul_residual_kernel(%arg0: i32, %arg1: i32, %arg2: i32, %arg3: memref<16x32xf32, #tpu.memory_space<vmem>>, %arg4: memref<32x32xf32, #tpu.memory_space<vmem>>, %arg5: memref<16x32xf32, #tpu.memory_space<vmem>>, %arg6: memref<16x32xf32, #tpu.memory_space<vmem>>, %arg7: memref<16x32xf32, #tpu.memory_space<vmem>>) attributes {dimension_semantics = [#tpu.dimension_semantics<parallel>, #tpu.dimension_semantics<parallel>, #tpu.dimension_semantics<arbitrary>], iteration_bounds = array<i64: 1, 1, 1>, scalar_prefetch = 0 : i64, scratch_operands = 1 : i64, tpu.core_type = #tpu.core_type<tc>, window_params = [{transform_indices = @transform_0, window_bounds = array<i64: 16, 32>}, {transform_indices = @transform_1, window_bounds = array<i64: 32, 32>}, {transform_indices = @transform_2, window_bounds = array<i64: 16, 32>}, {transform_indices = @transform_3, window_bounds = array<i64: 16, 32>}]} {
    %c0_i32 = arith.constant 0 : i32
    %0 = arith.cmpi eq, %arg2, %c0_i32 : i32
    %1 = arith.extui %0 : i1 to i32
    %c0_i32_0 = arith.constant 0 : i32
    %2 = arith.cmpi ne, %1, %c0_i32_0 : i32
    scf.if %2 {
      %cst_10 = arith.constant 0.000000e+00 : f32
      %12 = vector.broadcast %cst_10 : f32 to vector<16x32xf32>
      %c0_11 = arith.constant 0 : index
      %c0_12 = arith.constant 0 : index
      %13 = vector.load %arg7[%c0_11, %c0_12] : memref<16x32xf32, #tpu.memory_space<vmem>>, vector<16x32xf32>
      tpu.vector_store %arg7[%c0_11, %c0_12], %12 {strides = array<i32>} : memref<16x32xf32, #tpu.memory_space<vmem>>, vector<16x32xf32>,
    } else {
    }
    %c0 = arith.constant 0 : index
    %c0_1 = arith.constant 0 : index
    %3 = vector.load %arg7[%c0, %c0_1] : memref<16x32xf32, #tpu.memory_space<vmem>>, vector<16x32xf32>
    %c0_2 = arith.constant 0 : index
    %c0_3 = arith.constant 0 : index
    %4 = vector.load %arg3[%c0_2, %c0_3] : memref<16x32xf32, #tpu.memory_space<vmem>>, vector<16x32xf32>
    %c0_4 = arith.constant 0 : index
    %c0_5 = arith.constant 0 : index
    %5 = vector.load %arg4[%c0_4, %c0_5] : memref<32x32xf32, #tpu.memory_space<vmem>>, vector<32x32xf32>
    %cst = arith.constant dense<0.000000e+00> : vector<16x32xf32>
    %6 = tpu.matmul %4, %5, %cst {dimension_numbers = #tpu.dot_dimension_numbers<[1], [0], [0], [1], [0, 0, 1, 1], [], []>} : vector<16x32xf32>, vector<32x32xf32>, vector<16x32xf32> -> vector<16x32xf32>
    %7 = arith.addf %3, %6 : vector<16x32xf32>
    %c0_6 = arith.constant 0 : index
    %c0_7 = arith.constant 0 : index
    %8 = vector.load %arg7[%c0_6, %c0_7] : memref<16x32xf32, #tpu.memory_space<vmem>>, vector<16x32xf32>
    tpu.vector_store %arg7[%c0_6, %c0_7], %7 {strides = array<i32>} : memref<16x32xf32, #tpu.memory_space<vmem>>, vector<16x32xf32>,
    %c0_i32_8 = arith.constant 0 : i32
    %9 = arith.cmpi eq, %arg2, %c0_i32_8 : i32
    %10 = arith.extui %9 : i1 to i32
    %c0_i32_9 = arith.constant 0 : i32
    %11 = arith.cmpi ne, %10, %c0_i32_9 : i32
    scf.if %11 {
      %c0_10 = arith.constant 0 : index
      %c0_11 = arith.constant 0 : index
      %12 = vector.load %arg7[%c0_10, %c0_11] : memref<16x32xf32, #tpu.memory_space<vmem>>, vector<16x32xf32>
      %c0_12 = arith.constant 0 : index
      %c0_13 = arith.constant 0 : index
      %13 = vector.load %arg5[%c0_12, %c0_13] : memref<16x32xf32, #tpu.memory_space<vmem>>, vector<16x32xf32>
      %14 = arith.addf %12, %13 : vector<16x32xf32>
      %c0_14 = arith.constant 0 : index
      %c0_15 = arith.constant 0 : index
      %15 = vector.load %arg6[%c0_14, %c0_15] : memref<16x32xf32, #tpu.memory_space<vmem>>, vector<16x32xf32>
      tpu.vector_store %arg6[%c0_14, %c0_15], %14 {strides = array<i32>} : memref<16x32xf32, #tpu.memory_space<vmem>>, vector<16x32xf32>,
    } else {
    }
    return
  }
  func.func @transform_0(%arg0: i32, %arg1: i32, %arg2: i32) -> (i32, i32) {
    %c0_i32 = arith.constant 0 : i32
    return %arg0, %arg2 : i32, i32
  }
  func.func @transform_1(%arg0: i32, %arg1: i32, %arg2: i32) -> (i32, i32) {
    %c0_i32 = arith.constant 0 : i32
    return %arg2, %arg1 : i32, i32
  }
  func.func @transform_2(%arg0: i32, %arg1: i32, %arg2: i32) -> (i32, i32) {
    %c0_i32 = arith.constant 0 : i32
    return %arg0, %arg1 : i32, i32
  }
  func.func @transform_3(%arg0: i32, %arg1: i32, %arg2: i32) -> (i32, i32) {
    %c0_i32 = arith.constant 0 : i32
    return %arg0, %arg1 : i32, i32
  }
}

module attributes {stable_mosaic.version = 11 : i64} {
  func.func @_flash_attn_kernel(%arg0: i32, %arg1: i32, %arg2: i32, %arg3: memref<1x8x32xf32, #tpu.memory_space<vmem>>, %arg4: memref<1x8x16xf32, #tpu.memory_space<vmem>>, %arg5: memref<1x8x16xf32, #tpu.memory_space<vmem>>, %arg6: memref<1x8x32xf32, #tpu.memory_space<vmem>>, %arg7: memref<4x8x1xf32, #tpu.memory_space<vmem>>, %arg8: memref<4x8x1xf32, #tpu.memory_space<vmem>>, %arg9: memref<8x32xf32, #tpu.memory_space<vmem>>) attributes {dimension_semantics = [#tpu.dimension_semantics<parallel>, #tpu.dimension_semantics<parallel>, #tpu.dimension_semantics<arbitrary>], iteration_bounds = array<i64: 2, 1, 1>, scalar_prefetch = 0 : i64, scratch_operands = 3 : i64, tpu.core_type = #tpu.core_type<tc>, window_params = [{transform_indices = @transform_0, window_bounds = array<i64: 1, 8, 32>}, {transform_indices = @transform_1, window_bounds = array<i64: 1, 8, 16>}, {transform_indices = @transform_2, window_bounds = array<i64: 1, 8, 16>}, {transform_indices = @transform_3, window_bounds = array<i64: 1, 8, 32>}]} {
    %c0_i32 = arith.constant 0 : i32
    %0 = arith.cmpi eq, %arg2, %c0_i32 : i32
    %1 = arith.extui %0 : i1 to i32
    %c0_i32_0 = arith.constant 0 : i32
    %2 = arith.cmpi ne, %1, %c0_i32_0 : i32
    scf.if %2 {
      %cst_84 = arith.constant 0xFF800000 : f32
      %140 = vector.broadcast %cst_84 : f32 to vector<4x8x1xf32>
      %c0_85 = arith.constant 0 : index
      %c0_86 = arith.constant 0 : index
      %c0_87 = arith.constant 0 : index
      %141 = vector.load %arg7[%c0_85, %c0_86, %c0_87] : memref<4x8x1xf32, #tpu.memory_space<vmem>>, vector<4x8x1xf32>
      tpu.vector_store %arg7[%c0_85, %c0_86, %c0_87], %140 {strides = array<i32>} : memref<4x8x1xf32, #tpu.memory_space<vmem>>, vector<4x8x1xf32>,
      %cst_88 = arith.constant 0.000000e+00 : f32
      %142 = vector.broadcast %cst_88 : f32 to vector<4x8x1xf32>
      %c0_89 = arith.constant 0 : index
      %c0_90 = arith.constant 0 : index
      %c0_91 = arith.constant 0 : index
      %143 = vector.load %arg8[%c0_89, %c0_90, %c0_91] : memref<4x8x1xf32, #tpu.memory_space<vmem>>, vector<4x8x1xf32>
      tpu.vector_store %arg8[%c0_89, %c0_90, %c0_91], %142 {strides = array<i32>} : memref<4x8x1xf32, #tpu.memory_space<vmem>>, vector<4x8x1xf32>,
      %cst_92 = arith.constant 0.000000e+00 : f32
      %144 = vector.broadcast %cst_92 : f32 to vector<8x32xf32>
      %c0_93 = arith.constant 0 : index
      %c0_94 = arith.constant 0 : index
      %145 = vector.load %arg9[%c0_93, %c0_94] : memref<8x32xf32, #tpu.memory_space<vmem>>, vector<8x32xf32>
      tpu.vector_store %arg9[%c0_93, %c0_94], %144 {strides = array<i32>} : memref<8x32xf32, #tpu.memory_space<vmem>>, vector<8x32xf32>,
    } else {
    }
    %c0 = arith.constant 0 : index
    %c0_1 = arith.constant 0 : index
    %c0_2 = arith.constant 0 : index
    %3 = vector.load %arg3[%c0, %c0_1, %c0_2] : memref<1x8x32xf32, #tpu.memory_space<vmem>>, vector<1x8x32xf32>
    %4 = vector.shape_cast %3 : vector<1x8x32xf32> to vector<8x32xf32>
    %c0_3 = arith.constant 0 : index
    %c0_4 = arith.constant 0 : index
    %c0_5 = arith.constant 0 : index
    %5 = vector.load %arg4[%c0_3, %c0_4, %c0_5] : memref<1x8x16xf32, #tpu.memory_space<vmem>>, vector<1x8x16xf32>
    %6 = vector.shape_cast %5 : vector<1x8x16xf32> to vector<8x16xf32>
    %c0_6 = arith.constant 0 : index
    %c0_7 = arith.constant 0 : index
    %c0_8 = arith.constant 0 : index
    %7 = vector.load %arg5[%c0_6, %c0_7, %c0_8] : memref<1x8x16xf32, #tpu.memory_space<vmem>>, vector<1x8x16xf32>
    %8 = vector.shape_cast %7 : vector<1x8x16xf32> to vector<8x16xf32>
    %9 = vector.extract_strided_slice %4 {offsets = [0, 0], sizes = [8, 8], strides = [1, 1]} : vector<8x32xf32> to vector<8x8xf32>
    %10 = vector.extract_strided_slice %6 {offsets = [0, 0], sizes = [8, 8], strides = [1, 1]} : vector<8x16xf32> to vector<8x8xf32>
    %11 = vector.extract_strided_slice %8 {offsets = [0, 0], sizes = [8, 8], strides = [1, 1]} : vector<8x16xf32> to vector<8x8xf32>
    %cst = arith.constant dense<0.000000e+00> : vector<8x8xf32>
    %12 = tpu.matmul %9, %10, %cst {dimension_numbers = #tpu.dot_dimension_numbers<[1], [1], [0], [0], [0, 0, 1, 0], [], []>} : vector<8x8xf32>, vector<8x8xf32>, vector<8x8xf32> -> vector<8x8xf32>
    %c0_9 = arith.constant 0 : index
    %c0_10 = arith.constant 0 : index
    %c0_11 = arith.constant 0 : index
    %13 = vector.load %arg7[%c0_9, %c0_10, %c0_11] : memref<4x8x1xf32, #tpu.memory_space<vmem>>, vector<1x8x1xf32>
    %14 = vector.shape_cast %13 : vector<1x8x1xf32> to vector<8x1xf32>
    %cst_12 = arith.constant dense<0xFF800000> : vector<8xf32>
    %15 = vector.multi_reduction <maximumf>, %12, %cst_12 [1] : vector<8x8xf32> to vector<8xf32>
    %16 = vector.shape_cast %15 : vector<8xf32> to vector<8x1xf32>
    %17 = arith.maximumf %14, %16 : vector<8x1xf32>
    %18 = arith.subf %14, %17 : vector<8x1xf32>
    %19 = math.exp %18 : vector<8x1xf32>
    %20 = vector.broadcast %17 : vector<8x1xf32> to vector<8x8xf32>
    %21 = arith.subf %12, %20 : vector<8x8xf32>
    %22 = math.exp %21 : vector<8x8xf32>
    %c0_13 = arith.constant 0 : index
    %c0_14 = arith.constant 0 : index
    %c0_15 = arith.constant 0 : index
    %23 = vector.load %arg8[%c0_13, %c0_14, %c0_15] : memref<4x8x1xf32, #tpu.memory_space<vmem>>, vector<1x8x1xf32>
    %24 = vector.shape_cast %23 : vector<1x8x1xf32> to vector<8x1xf32>
    %25 = arith.mulf %19, %24 : vector<8x1xf32>
    %cst_16 = arith.constant dense<0.000000e+00> : vector<8xf32>
    %26 = vector.multi_reduction <add>, %22, %cst_16 [1] : vector<8x8xf32> to vector<8xf32>
    %27 = vector.shape_cast %26 : vector<8xf32> to vector<8x1xf32>
    %28 = arith.addf %25, %27 : vector<8x1xf32>
    %c0_17 = arith.constant 0 : index
    %c0_18 = arith.constant 0 : index
    %c0_19 = arith.constant 0 : index
    %29 = vector.load %arg8[%c0_17, %c0_18, %c0_19] : memref<4x8x1xf32, #tpu.memory_space<vmem>>, vector<1x8x1xf32>
    %30 = vector.shape_cast %29 : vector<1x8x1xf32> to vector<8x1xf32>
    %31 = vector.shape_cast %28 : vector<8x1xf32> to vector<1x8x1xf32>
    tpu.vector_store %arg8[%c0_17, %c0_18, %c0_19], %31 {strides = array<i32>} : memref<4x8x1xf32, #tpu.memory_space<vmem>>, vector<1x8x1xf32>,
    %cst_20 = arith.constant dense<0.000000e+00> : vector<8x8xf32>
    %32 = tpu.matmul %22, %11, %cst_20 {dimension_numbers = #tpu.dot_dimension_numbers<[1], [0], [0], [1], [0, 0, 1, 1], [], []>} : vector<8x8xf32>, vector<8x8xf32>, vector<8x8xf32> -> vector<8x8xf32>
    %c0_21 = arith.constant 0 : index
    %c0_22 = arith.constant 0 : index
    %33 = vector.load %arg9[%c0_21, %c0_22] : memref<8x32xf32, #tpu.memory_space<vmem>>, vector<8x8xf32>
    %34 = vector.broadcast %19 : vector<8x1xf32> to vector<8x8xf32>
    %35 = arith.mulf %34, %33 : vector<8x8xf32>
    %36 = arith.addf %35, %32 : vector<8x8xf32>
    %c0_23 = arith.constant 0 : index
    %c0_24 = arith.constant 0 : index
    %37 = vector.load %arg9[%c0_23, %c0_24] : memref<8x32xf32, #tpu.memory_space<vmem>>, vector<8x8xf32>
    tpu.vector_store %arg9[%c0_23, %c0_24], %36 {strides = array<i32>} : memref<8x32xf32, #tpu.memory_space<vmem>>, vector<8x8xf32>,
    %c0_25 = arith.constant 0 : index
    %c0_26 = arith.constant 0 : index
    %c0_27 = arith.constant 0 : index
    %38 = vector.load %arg7[%c0_25, %c0_26, %c0_27] : memref<4x8x1xf32, #tpu.memory_space<vmem>>, vector<1x8x1xf32>
    %39 = vector.shape_cast %38 : vector<1x8x1xf32> to vector<8x1xf32>
    %40 = vector.shape_cast %17 : vector<8x1xf32> to vector<1x8x1xf32>
    tpu.vector_store %arg7[%c0_25, %c0_26, %c0_27], %40 {strides = array<i32>} : memref<4x8x1xf32, #tpu.memory_space<vmem>>, vector<1x8x1xf32>,
    %41 = vector.extract_strided_slice %4 {offsets = [0, 8], sizes = [8, 8], strides = [1, 1]} : vector<8x32xf32> to vector<8x8xf32>
    %42 = vector.extract_strided_slice %6 {offsets = [0, 8], sizes = [8, 8], strides = [1, 1]} : vector<8x16xf32> to vector<8x8xf32>
    %43 = vector.extract_strided_slice %8 {offsets = [0, 8], sizes = [8, 8], strides = [1, 1]} : vector<8x16xf32> to vector<8x8xf32>
    %cst_28 = arith.constant dense<0.000000e+00> : vector<8x8xf32>
    %44 = tpu.matmul %41, %42, %cst_28 {dimension_numbers = #tpu.dot_dimension_numbers<[1], [1], [0], [0], [0, 0, 1, 0], [], []>} : vector<8x8xf32>, vector<8x8xf32>, vector<8x8xf32> -> vector<8x8xf32>
    %c1 = arith.constant 1 : index
    %c0_29 = arith.constant 0 : index
    %c0_30 = arith.constant 0 : index
    %45 = vector.load %arg7[%c1, %c0_29, %c0_30] : memref<4x8x1xf32, #tpu.memory_space<vmem>>, vector<1x8x1xf32>
    %46 = vector.shape_cast %45 : vector<1x8x1xf32> to vector<8x1xf32>
    %cst_31 = arith.constant dense<0xFF800000> : vector<8xf32>
    %47 = vector.multi_reduction <maximumf>, %44, %cst_31 [1] : vector<8x8xf32> to vector<8xf32>
    %48 = vector.shape_cast %47 : vector<8xf32> to vector<8x1xf32>
    %49 = arith.maximumf %46, %48 : vector<8x1xf32>
    %50 = arith.subf %46, %49 : vector<8x1xf32>
    %51 = math.exp %50 : vector<8x1xf32>
    %52 = vector.broadcast %49 : vector<8x1xf32> to vector<8x8xf32>
    %53 = arith.subf %44, %52 : vector<8x8xf32>
    %54 = math.exp %53 : vector<8x8xf32>
    %c1_32 = arith.constant 1 : index
    %c0_33 = arith.constant 0 : index
    %c0_34 = arith.constant 0 : index
    %55 = vector.load %arg8[%c1_32, %c0_33, %c0_34] : memref<4x8x1xf32, #tpu.memory_space<vmem>>, vector<1x8x1xf32>
    %56 = vector.shape_cast %55 : vector<1x8x1xf32> to vector<8x1xf32>
    %57 = arith.mulf %51, %56 : vector<8x1xf32>
    %cst_35 = arith.constant dense<0.000000e+00> : vector<8xf32>
    %58 = vector.multi_reduction <add>, %54, %cst_35 [1] : vector<8x8xf32> to vector<8xf32>
    %59 = vector.shape_cast %58 : vector<8xf32> to vector<8x1xf32>
    %60 = arith.addf %57, %59 : vector<8x1xf32>
    %c1_36 = arith.constant 1 : index
    %c0_37 = arith.constant 0 : index
    %c0_38 = arith.constant 0 : index
    %61 = vector.load %arg8[%c1_36, %c0_37, %c0_38] : memref<4x8x1xf32, #tpu.memory_space<vmem>>, vector<1x8x1xf32>
    %62 = vector.shape_cast %61 : vector<1x8x1xf32> to vector<8x1xf32>
    %63 = vector.shape_cast %60 : vector<8x1xf32> to vector<1x8x1xf32>
    tpu.vector_store %arg8[%c1_36, %c0_37, %c0_38], %63 {strides = array<i32>} : memref<4x8x1xf32, #tpu.memory_space<vmem>>, vector<1x8x1xf32>,
    %cst_39 = arith.constant dense<0.000000e+00> : vector<8x8xf32>
    %64 = tpu.matmul %54, %43, %cst_39 {dimension_numbers = #tpu.dot_dimension_numbers<[1], [0], [0], [1], [0, 0, 1, 1], [], []>} : vector<8x8xf32>, vector<8x8xf32>, vector<8x8xf32> -> vector<8x8xf32>
    %c0_40 = arith.constant 0 : index
    %c8 = arith.constant 8 : index
    %65 = vector.load %arg9[%c0_40, %c8] : memref<8x32xf32, #tpu.memory_space<vmem>>, vector<8x8xf32>
    %66 = vector.broadcast %51 : vector<8x1xf32> to vector<8x8xf32>
    %67 = arith.mulf %66, %65 : vector<8x8xf32>
    %68 = arith.addf %67, %64 : vector<8x8xf32>
    %c0_41 = arith.constant 0 : index
    %c8_42 = arith.constant 8 : index
    %69 = vector.load %arg9[%c0_41, %c8_42] : memref<8x32xf32, #tpu.memory_space<vmem>>, vector<8x8xf32>
    tpu.vector_store %arg9[%c0_41, %c8_42], %68 {strides = array<i32>} : memref<8x32xf32, #tpu.memory_space<vmem>>, vector<8x8xf32>,
    %c1_43 = arith.constant 1 : index
    %c0_44 = arith.constant 0 : index
    %c0_45 = arith.constant 0 : index
    %70 = vector.load %arg7[%c1_43, %c0_44, %c0_45] : memref<4x8x1xf32, #tpu.memory_space<vmem>>, vector<1x8x1xf32>
    %71 = vector.shape_cast %70 : vector<1x8x1xf32> to vector<8x1xf32>
    %72 = vector.shape_cast %49 : vector<8x1xf32> to vector<1x8x1xf32>
    tpu.vector_store %arg7[%c1_43, %c0_44, %c0_45], %72 {strides = array<i32>} : memref<4x8x1xf32, #tpu.memory_space<vmem>>, vector<1x8x1xf32>,
    %73 = vector.extract_strided_slice %4 {offsets = [0, 16], sizes = [8, 8], strides = [1, 1]} : vector<8x32xf32> to vector<8x8xf32>
    %74 = vector.extract_strided_slice %6 {offsets = [0, 0], sizes = [8, 8], strides = [1, 1]} : vector<8x16xf32> to vector<8x8xf32>
    %75 = vector.extract_strided_slice %8 {offsets = [0, 0], sizes = [8, 8], strides = [1, 1]} : vector<8x16xf32> to vector<8x8xf32>
    %cst_46 = arith.constant dense<0.000000e+00> : vector<8x8xf32>
    %76 = tpu.matmul %73, %74, %cst_46 {dimension_numbers = #tpu.dot_dimension_numbers<[1], [1], [0], [0], [0, 0, 1, 0], [], []>} : vector<8x8xf32>, vector<8x8xf32>, vector<8x8xf32> -> vector<8x8xf32>
    %c2 = arith.constant 2 : index
    %c0_47 = arith.constant 0 : index
    %c0_48 = arith.constant 0 : index
    %77 = vector.load %arg7[%c2, %c0_47, %c0_48] : memref<4x8x1xf32, #tpu.memory_space<vmem>>, vector<1x8x1xf32>
    %78 = vector.shape_cast %77 : vector<1x8x1xf32> to vector<8x1xf32>
    %cst_49 = arith.constant dense<0xFF800000> : vector<8xf32>
    %79 = vector.multi_reduction <maximumf>, %76, %cst_49 [1] : vector<8x8xf32> to vector<8xf32>
    %80 = vector.shape_cast %79 : vector<8xf32> to vector<8x1xf32>
    %81 = arith.maximumf %78, %80 : vector<8x1xf32>
    %82 = arith.subf %78, %81 : vector<8x1xf32>
    %83 = math.exp %82 : vector<8x1xf32>
    %84 = vector.broadcast %81 : vector<8x1xf32> to vector<8x8xf32>
    %85 = arith.subf %76, %84 : vector<8x8xf32>
    %86 = math.exp %85 : vector<8x8xf32>
    %c2_50 = arith.constant 2 : index
    %c0_51 = arith.constant 0 : index
    %c0_52 = arith.constant 0 : index
    %87 = vector.load %arg8[%c2_50, %c0_51, %c0_52] : memref<4x8x1xf32, #tpu.memory_space<vmem>>, vector<1x8x1xf32>
    %88 = vector.shape_cast %87 : vector<1x8x1xf32> to vector<8x1xf32>
    %89 = arith.mulf %83, %88 : vector<8x1xf32>
    %cst_53 = arith.constant dense<0.000000e+00> : vector<8xf32>
    %90 = vector.multi_reduction <add>, %86, %cst_53 [1] : vector<8x8xf32> to vector<8xf32>
    %91 = vector.shape_cast %90 : vector<8xf32> to vector<8x1xf32>
    %92 = arith.addf %89, %91 : vector<8x1xf32>
    %c2_54 = arith.constant 2 : index
    %c0_55 = arith.constant 0 : index
    %c0_56 = arith.constant 0 : index
    %93 = vector.load %arg8[%c2_54, %c0_55, %c0_56] : memref<4x8x1xf32, #tpu.memory_space<vmem>>, vector<1x8x1xf32>
    %94 = vector.shape_cast %93 : vector<1x8x1xf32> to vector<8x1xf32>
    %95 = vector.shape_cast %92 : vector<8x1xf32> to vector<1x8x1xf32>
    tpu.vector_store %arg8[%c2_54, %c0_55, %c0_56], %95 {strides = array<i32>} : memref<4x8x1xf32, #tpu.memory_space<vmem>>, vector<1x8x1xf32>,
    %cst_57 = arith.constant dense<0.000000e+00> : vector<8x8xf32>
    %96 = tpu.matmul %86, %75, %cst_57 {dimension_numbers = #tpu.dot_dimension_numbers<[1], [0], [0], [1], [0, 0, 1, 1], [], []>} : vector<8x8xf32>, vector<8x8xf32>, vector<8x8xf32> -> vector<8x8xf32>
    %c0_58 = arith.constant 0 : index
    %c16 = arith.constant 16 : index
    %97 = vector.load %arg9[%c0_58, %c16] : memref<8x32xf32, #tpu.memory_space<vmem>>, vector<8x8xf32>
    %98 = vector.broadcast %83 : vector<8x1xf32> to vector<8x8xf32>
    %99 = arith.mulf %98, %97 : vector<8x8xf32>
    %100 = arith.addf %99, %96 : vector<8x8xf32>
    %c0_59 = arith.constant 0 : index
    %c16_60 = arith.constant 16 : index
    %101 = vector.load %arg9[%c0_59, %c16_60] : memref<8x32xf32, #tpu.memory_space<vmem>>, vector<8x8xf32>
    tpu.vector_store %arg9[%c0_59, %c16_60], %100 {strides = array<i32>} : memref<8x32xf32, #tpu.memory_space<vmem>>, vector<8x8xf32>,
    %c2_61 = arith.constant 2 : index
    %c0_62 = arith.constant 0 : index
    %c0_63 = arith.constant 0 : index
    %102 = vector.load %arg7[%c2_61, %c0_62, %c0_63] : memref<4x8x1xf32, #tpu.memory_space<vmem>>, vector<1x8x1xf32>
    %103 = vector.shape_cast %102 : vector<1x8x1xf32> to vector<8x1xf32>
    %104 = vector.shape_cast %81 : vector<8x1xf32> to vector<1x8x1xf32>
    tpu.vector_store %arg7[%c2_61, %c0_62, %c0_63], %104 {strides = array<i32>} : memref<4x8x1xf32, #tpu.memory_space<vmem>>, vector<1x8x1xf32>,
    %105 = vector.extract_strided_slice %4 {offsets = [0, 24], sizes = [8, 8], strides = [1, 1]} : vector<8x32xf32> to vector<8x8xf32>
    %106 = vector.extract_strided_slice %6 {offsets = [0, 8], sizes = [8, 8], strides = [1, 1]} : vector<8x16xf32> to vector<8x8xf32>
    %107 = vector.extract_strided_slice %8 {offsets = [0, 8], sizes = [8, 8], strides = [1, 1]} : vector<8x16xf32> to vector<8x8xf32>
    %cst_64 = arith.constant dense<0.000000e+00> : vector<8x8xf32>
    %108 = tpu.matmul %105, %106, %cst_64 {dimension_numbers = #tpu.dot_dimension_numbers<[1], [1], [0], [0], [0, 0, 1, 0], [], []>} : vector<8x8xf32>, vector<8x8xf32>, vector<8x8xf32> -> vector<8x8xf32>
    %c3 = arith.constant 3 : index
    %c0_65 = arith.constant 0 : index
    %c0_66 = arith.constant 0 : index
    %109 = vector.load %arg7[%c3, %c0_65, %c0_66] : memref<4x8x1xf32, #tpu.memory_space<vmem>>, vector<1x8x1xf32>
    %110 = vector.shape_cast %109 : vector<1x8x1xf32> to vector<8x1xf32>
    %cst_67 = arith.constant dense<0xFF800000> : vector<8xf32>
    %111 = vector.multi_reduction <maximumf>, %108, %cst_67 [1] : vector<8x8xf32> to vector<8xf32>
    %112 = vector.shape_cast %111 : vector<8xf32> to vector<8x1xf32>
    %113 = arith.maximumf %110, %112 : vector<8x1xf32>
    %114 = arith.subf %110, %113 : vector<8x1xf32>
    %115 = math.exp %114 : vector<8x1xf32>
    %116 = vector.broadcast %113 : vector<8x1xf32> to vector<8x8xf32>
    %117 = arith.subf %108, %116 : vector<8x8xf32>
    %118 = math.exp %117 : vector<8x8xf32>
    %c3_68 = arith.constant 3 : index
    %c0_69 = arith.constant 0 : index
    %c0_70 = arith.constant 0 : index
    %119 = vector.load %arg8[%c3_68, %c0_69, %c0_70] : memref<4x8x1xf32, #tpu.memory_space<vmem>>, vector<1x8x1xf32>
    %120 = vector.shape_cast %119 : vector<1x8x1xf32> to vector<8x1xf32>
    %121 = arith.mulf %115, %120 : vector<8x1xf32>
    %cst_71 = arith.constant dense<0.000000e+00> : vector<8xf32>
    %122 = vector.multi_reduction <add>, %118, %cst_71 [1] : vector<8x8xf32> to vector<8xf32>
    %123 = vector.shape_cast %122 : vector<8xf32> to vector<8x1xf32>
    %124 = arith.addf %121, %123 : vector<8x1xf32>
    %c3_72 = arith.constant 3 : index
    %c0_73 = arith.constant 0 : index
    %c0_74 = arith.constant 0 : index
    %125 = vector.load %arg8[%c3_72, %c0_73, %c0_74] : memref<4x8x1xf32, #tpu.memory_space<vmem>>, vector<1x8x1xf32>
    %126 = vector.shape_cast %125 : vector<1x8x1xf32> to vector<8x1xf32>
    %127 = vector.shape_cast %124 : vector<8x1xf32> to vector<1x8x1xf32>
    tpu.vector_store %arg8[%c3_72, %c0_73, %c0_74], %127 {strides = array<i32>} : memref<4x8x1xf32, #tpu.memory_space<vmem>>, vector<1x8x1xf32>,
    %cst_75 = arith.constant dense<0.000000e+00> : vector<8x8xf32>
    %128 = tpu.matmul %118, %107, %cst_75 {dimension_numbers = #tpu.dot_dimension_numbers<[1], [0], [0], [1], [0, 0, 1, 1], [], []>} : vector<8x8xf32>, vector<8x8xf32>, vector<8x8xf32> -> vector<8x8xf32>
    %c0_76 = arith.constant 0 : index
    %c24 = arith.constant 24 : index
    %129 = vector.load %arg9[%c0_76, %c24] : memref<8x32xf32, #tpu.memory_space<vmem>>, vector<8x8xf32>
    %130 = vector.broadcast %115 : vector<8x1xf32> to vector<8x8xf32>
    %131 = arith.mulf %130, %129 : vector<8x8xf32>
    %132 = arith.addf %131, %128 : vector<8x8xf32>
    %c0_77 = arith.constant 0 : index
    %c24_78 = arith.constant 24 : index
    %133 = vector.load %arg9[%c0_77, %c24_78] : memref<8x32xf32, #tpu.memory_space<vmem>>, vector<8x8xf32>
    tpu.vector_store %arg9[%c0_77, %c24_78], %132 {strides = array<i32>} : memref<8x32xf32, #tpu.memory_space<vmem>>, vector<8x8xf32>,
    %c3_79 = arith.constant 3 : index
    %c0_80 = arith.constant 0 : index
    %c0_81 = arith.constant 0 : index
    %134 = vector.load %arg7[%c3_79, %c0_80, %c0_81] : memref<4x8x1xf32, #tpu.memory_space<vmem>>, vector<1x8x1xf32>
    %135 = vector.shape_cast %134 : vector<1x8x1xf32> to vector<8x1xf32>
    %136 = vector.shape_cast %113 : vector<8x1xf32> to vector<1x8x1xf32>
    tpu.vector_store %arg7[%c3_79, %c0_80, %c0_81], %136 {strides = array<i32>} : memref<4x8x1xf32, #tpu.memory_space<vmem>>, vector<1x8x1xf32>,
    %c0_i32_82 = arith.constant 0 : i32
    %137 = arith.cmpi eq, %arg2, %c0_i32_82 : i32
    %138 = arith.extui %137 : i1 to i32
    %c0_i32_83 = arith.constant 0 : i32
    %139 = arith.cmpi ne, %138, %c0_i32_83 : i32
    scf.if %139 {
      %c0_84 = arith.constant 0 : index
      %c0_85 = arith.constant 0 : index
      %c0_86 = arith.constant 0 : index
      %140 = vector.load %arg8[%c0_84, %c0_85, %c0_86] : memref<4x8x1xf32, #tpu.memory_space<vmem>>, vector<1x8x1xf32>
      %141 = vector.shape_cast %140 : vector<1x8x1xf32> to vector<8x1xf32>
      %142 = tpu.reciprocal %141 {approx = true} : vector<8x1xf32> -> vector<8x1xf32>
      %c0_87 = arith.constant 0 : index
      %c0_88 = arith.constant 0 : index
      %143 = vector.load %arg9[%c0_87, %c0_88] : memref<8x32xf32, #tpu.memory_space<vmem>>, vector<8x8xf32>
      %144 = vector.broadcast %142 : vector<8x1xf32> to vector<8x8xf32>
      %145 = arith.mulf %143, %144 : vector<8x8xf32>
      %c0_89 = arith.constant 0 : index
      %c0_90 = arith.constant 0 : index
      %c0_91 = arith.constant 0 : index
      %146 = vector.load %arg6[%c0_89, %c0_90, %c0_91] : memref<1x8x32xf32, #tpu.memory_space<vmem>>, vector<1x8x8xf32>
      %147 = vector.shape_cast %146 : vector<1x8x8xf32> to vector<8x8xf32>
      %148 = vector.shape_cast %145 : vector<8x8xf32> to vector<1x8x8xf32>
      tpu.vector_store %arg6[%c0_89, %c0_90, %c0_91], %148 {strides = array<i32>} : memref<1x8x32xf32, #tpu.memory_space<vmem>>, vector<1x8x8xf32>,
      %c1_92 = arith.constant 1 : index
      %c0_93 = arith.constant 0 : index
      %c0_94 = arith.constant 0 : index
      %149 = vector.load %arg8[%c1_92, %c0_93, %c0_94] : memref<4x8x1xf32, #tpu.memory_space<vmem>>, vector<1x8x1xf32>
      %150 = vector.shape_cast %149 : vector<1x8x1xf32> to vector<8x1xf32>
      %151 = tpu.reciprocal %150 {approx = true} : vector<8x1xf32> -> vector<8x1xf32>
      %c0_95 = arith.constant 0 : index
      %c8_96 = arith.constant 8 : index
      %152 = vector.load %arg9[%c0_95, %c8_96] : memref<8x32xf32, #tpu.memory_space<vmem>>, vector<8x8xf32>
      %153 = vector.broadcast %151 : vector<8x1xf32> to vector<8x8xf32>
      %154 = arith.mulf %152, %153 : vector<8x8xf32>
      %c0_97 = arith.constant 0 : index
      %c0_98 = arith.constant 0 : index
      %c8_99 = arith.constant 8 : index
      %155 = vector.load %arg6[%c0_97, %c0_98, %c8_99] : memref<1x8x32xf32, #tpu.memory_space<vmem>>, vector<1x8x8xf32>
      %156 = vector.shape_cast %155 : vector<1x8x8xf32> to vector<8x8xf32>
      %157 = vector.shape_cast %154 : vector<8x8xf32> to vector<1x8x8xf32>
      tpu.vector_store %arg6[%c0_97, %c0_98, %c8_99], %157 {strides = array<i32>} : memref<1x8x32xf32, #tpu.memory_space<vmem>>, vector<1x8x8xf32>,
      %c2_100 = arith.constant 2 : index
      %c0_101 = arith.constant 0 : index
      %c0_102 = arith.constant 0 : index
      %158 = vector.load %arg8[%c2_100, %c0_101, %c0_102] : memref<4x8x1xf32, #tpu.memory_space<vmem>>, vector<1x8x1xf32>
      %159 = vector.shape_cast %158 : vector<1x8x1xf32> to vector<8x1xf32>
      %160 = tpu.reciprocal %159 {approx = true} : vector<8x1xf32> -> vector<8x1xf32>
      %c0_103 = arith.constant 0 : index
      %c16_104 = arith.constant 16 : index
      %161 = vector.load %arg9[%c0_103, %c16_104] : memref<8x32xf32, #tpu.memory_space<vmem>>, vector<8x8xf32>
      %162 = vector.broadcast %160 : vector<8x1xf32> to vector<8x8xf32>
      %163 = arith.mulf %161, %162 : vector<8x8xf32>
      %c0_105 = arith.constant 0 : index
      %c0_106 = arith.constant 0 : index
      %c16_107 = arith.constant 16 : index
      %164 = vector.load %arg6[%c0_105, %c0_106, %c16_107] : memref<1x8x32xf32, #tpu.memory_space<vmem>>, vector<1x8x8xf32>
      %165 = vector.shape_cast %164 : vector<1x8x8xf32> to vector<8x8xf32>
      %166 = vector.shape_cast %163 : vector<8x8xf32> to vector<1x8x8xf32>
      tpu.vector_store %arg6[%c0_105, %c0_106, %c16_107], %166 {strides = array<i32>} : memref<1x8x32xf32, #tpu.memory_space<vmem>>, vector<1x8x8xf32>,
      %c3_108 = arith.constant 3 : index
      %c0_109 = arith.constant 0 : index
      %c0_110 = arith.constant 0 : index
      %167 = vector.load %arg8[%c3_108, %c0_109, %c0_110] : memref<4x8x1xf32, #tpu.memory_space<vmem>>, vector<1x8x1xf32>
      %168 = vector.shape_cast %167 : vector<1x8x1xf32> to vector<8x1xf32>
      %169 = tpu.reciprocal %168 {approx = true} : vector<8x1xf32> -> vector<8x1xf32>
      %c0_111 = arith.constant 0 : index
      %c24_112 = arith.constant 24 : index
      %170 = vector.load %arg9[%c0_111, %c24_112] : memref<8x32xf32, #tpu.memory_space<vmem>>, vector<8x8xf32>
      %171 = vector.broadcast %169 : vector<8x1xf32> to vector<8x8xf32>
      %172 = arith.mulf %170, %171 : vector<8x8xf32>
      %c0_113 = arith.constant 0 : index
      %c0_114 = arith.constant 0 : index
      %c24_115 = arith.constant 24 : index
      %173 = vector.load %arg6[%c0_113, %c0_114, %c24_115] : memref<1x8x32xf32, #tpu.memory_space<vmem>>, vector<1x8x8xf32>
      %174 = vector.shape_cast %173 : vector<1x8x8xf32> to vector<8x8xf32>
      %175 = vector.shape_cast %172 : vector<8x8xf32> to vector<1x8x8xf32>
      tpu.vector_store %arg6[%c0_113, %c0_114, %c24_115], %175 {strides = array<i32>} : memref<1x8x32xf32, #tpu.memory_space<vmem>>, vector<1x8x8xf32>,
    } else {
    }
    return
  }
  func.func @transform_0(%arg0: i32, %arg1: i32, %arg2: i32) -> (i32, i32, i32) {
    %c0_i32 = arith.constant 0 : i32
    %c0_i32_0 = arith.constant 0 : i32
    return %arg0, %arg1, %c0_i32 : i32, i32, i32
  }
  func.func @transform_1(%arg0: i32, %arg1: i32, %arg2: i32) -> (i32, i32, i32) {
    %c0_i32 = arith.constant 0 : i32
    %c0_i32_0 = arith.constant 0 : i32
    return %arg0, %arg2, %c0_i32 : i32, i32, i32
  }
  func.func @transform_2(%arg0: i32, %arg1: i32, %arg2: i32) -> (i32, i32, i32) {
    %c0_i32 = arith.constant 0 : i32
    %c0_i32_0 = arith.constant 0 : i32
    return %arg0, %arg2, %c0_i32 : i32, i32, i32
  }
  func.func @transform_3(%arg0: i32, %arg1: i32, %arg2: i32) -> (i32, i32, i32) {
    %c0_i32 = arith.constant 0 : i32
    %c0_i32_0 = arith.constant 0 : i32
    return %arg0, %arg1, %c0_i32 : i32, i32, i32
  }
}

module attributes {stable_mosaic.version = 11 : i64} {
  func.func @_ffn_kernel(%arg0: i32, %arg1: i32, %arg2: memref<16x32xf32, #tpu.memory_space<vmem>>, %arg3: memref<32x128xf32, #tpu.memory_space<vmem>>, %arg4: memref<32x128xf32, #tpu.memory_space<vmem>>, %arg5: memref<128x32xf32, #tpu.memory_space<vmem>>, %arg6: memref<1x32xf32, #tpu.memory_space<vmem>>, %arg7: memref<16x32xf32, #tpu.memory_space<vmem>>, %arg8: memref<16x32xf32, #tpu.memory_space<vmem>>, %arg9: memref<16x32xf32, #tpu.memory_space<vmem>>) attributes {dimension_semantics = [#tpu.dimension_semantics<parallel>, #tpu.dimension_semantics<arbitrary>], iteration_bounds = array<i64: 1, 1>, scalar_prefetch = 0 : i64, scratch_operands = 2 : i64, tpu.core_type = #tpu.core_type<tc>, window_params = [{transform_indices = @transform_0, window_bounds = array<i64: 16, 32>}, {transform_indices = @transform_1, window_bounds = array<i64: 32, 128>}, {transform_indices = @transform_2, window_bounds = array<i64: 32, 128>}, {transform_indices = @transform_3, window_bounds = array<i64: 128, 32>}, {pipeline_mode = #tpu.pipeline_mode<synchronous>, transform_indices = @transform_4, window_bounds = array<i64: 1, 32>}, {transform_indices = @transform_5, window_bounds = array<i64: 16, 32>}]} {
    %c0_i32 = arith.constant 0 : i32
    %0 = arith.cmpi eq, %arg1, %c0_i32 : i32
    %1 = arith.extui %0 : i1 to i32
    %c0_i32_0 = arith.constant 0 : i32
    %2 = arith.cmpi ne, %1, %c0_i32_0 : i32
    scf.if %2 {
      %c0_18 = arith.constant 0 : index
      %c0_19 = arith.constant 0 : index
      %24 = vector.load %arg2[%c0_18, %c0_19] : memref<16x32xf32, #tpu.memory_space<vmem>>, vector<16x32xf32>
      %25 = arith.mulf %24, %24 : vector<16x32xf32>
      %cst_20 = arith.constant dense<0.000000e+00> : vector<16xf32>
      %26 = vector.multi_reduction <add>, %25, %cst_20 [1] : vector<16x32xf32> to vector<16xf32>
      %27 = vector.shape_cast %26 : vector<16xf32> to vector<16x1xf32>
      %cst_21 = arith.constant 3.200000e+01 : f32
      %28 = vector.broadcast %cst_21 : f32 to vector<16x1xf32>
      %29 = arith.divf %27, %28 : vector<16x1xf32>
      %cst_22 = arith.constant 9.99999997E-7 : f32
      %30 = vector.broadcast %cst_22 : f32 to vector<16x1xf32>
      %31 = arith.addf %29, %30 : vector<16x1xf32>
      %32 = math.rsqrt %31 : vector<16x1xf32>
      %33 = vector.broadcast %32 : vector<16x1xf32> to vector<16x32xf32>
      %34 = arith.mulf %24, %33 : vector<16x32xf32>
      %c0_23 = arith.constant 0 : index
      %c0_24 = arith.constant 0 : index
      %35 = vector.load %arg6[%c0_23, %c0_24] : memref<1x32xf32, #tpu.memory_space<vmem>>, vector<1x32xf32>
      %36 = vector.broadcast %35 : vector<1x32xf32> to vector<16x32xf32>
      %37 = arith.mulf %34, %36 : vector<16x32xf32>
      %c0_25 = arith.constant 0 : index
      %c0_26 = arith.constant 0 : index
      %38 = vector.load %arg8[%c0_25, %c0_26] : memref<16x32xf32, #tpu.memory_space<vmem>>, vector<16x32xf32>
      tpu.vector_store %arg8[%c0_25, %c0_26], %37 {strides = array<i32>} : memref<16x32xf32, #tpu.memory_space<vmem>>, vector<16x32xf32>,
      %cst_27 = arith.constant 0.000000e+00 : f32
      %39 = vector.broadcast %cst_27 : f32 to vector<16x32xf32>
      %c0_28 = arith.constant 0 : index
      %c0_29 = arith.constant 0 : index
      %40 = vector.load %arg9[%c0_28, %c0_29] : memref<16x32xf32, #tpu.memory_space<vmem>>, vector<16x32xf32>
      tpu.vector_store %arg9[%c0_28, %c0_29], %39 {strides = array<i32>} : memref<16x32xf32, #tpu.memory_space<vmem>>, vector<16x32xf32>,
    } else {
    }
    %c0 = arith.constant 0 : index
    %c0_1 = arith.constant 0 : index
    %3 = vector.load %arg8[%c0, %c0_1] : memref<16x32xf32, #tpu.memory_space<vmem>>, vector<16x32xf32>
    %c0_2 = arith.constant 0 : index
    %c0_3 = arith.constant 0 : index
    %4 = vector.load %arg3[%c0_2, %c0_3] : memref<32x128xf32, #tpu.memory_space<vmem>>, vector<32x128xf32>
    %cst = arith.constant dense<0.000000e+00> : vector<16x128xf32>
    %5 = tpu.matmul %3, %4, %cst {dimension_numbers = #tpu.dot_dimension_numbers<[1], [0], [0], [1], [0, 0, 1, 1], [], []>} : vector<16x32xf32>, vector<32x128xf32>, vector<16x128xf32> -> vector<16x128xf32>
    %c0_4 = arith.constant 0 : index
    %c0_5 = arith.constant 0 : index
    %6 = vector.load %arg4[%c0_4, %c0_5] : memref<32x128xf32, #tpu.memory_space<vmem>>, vector<32x128xf32>
    %cst_6 = arith.constant dense<0.000000e+00> : vector<16x128xf32>
    %7 = tpu.matmul %3, %6, %cst_6 {dimension_numbers = #tpu.dot_dimension_numbers<[1], [0], [0], [1], [0, 0, 1, 1], [], []>} : vector<16x32xf32>, vector<32x128xf32>, vector<16x128xf32> -> vector<16x128xf32>
    %cst_7 = arith.constant 0.000000e+00 : f32
    %8 = vector.broadcast %cst_7 : f32 to vector<16x128xf32>
    %9 = arith.subf %8, %5 : vector<16x128xf32>
    %10 = math.exp %9 : vector<16x128xf32>
    %cst_8 = arith.constant 1.000000e+00 : f32
    %11 = vector.broadcast %cst_8 : f32 to vector<16x128xf32>
    %12 = arith.addf %11, %10 : vector<16x128xf32>
    %13 = tpu.reciprocal %12 {approx = true} : vector<16x128xf32> -> vector<16x128xf32>
    %14 = arith.mulf %5, %13 : vector<16x128xf32>
    %15 = arith.mulf %14, %7 : vector<16x128xf32>
    %c0_9 = arith.constant 0 : index
    %c0_10 = arith.constant 0 : index
    %16 = vector.load %arg9[%c0_9, %c0_10] : memref<16x32xf32, #tpu.memory_space<vmem>>, vector<16x32xf32>
    %c0_11 = arith.constant 0 : index
    %c0_12 = arith.constant 0 : index
    %17 = vector.load %arg5[%c0_11, %c0_12] : memref<128x32xf32, #tpu.memory_space<vmem>>, vector<128x32xf32>
    %cst_13 = arith.constant dense<0.000000e+00> : vector<16x32xf32>
    %18 = tpu.matmul %15, %17, %cst_13 {dimension_numbers = #tpu.dot_dimension_numbers<[1], [0], [0], [1], [0, 0, 1, 1], [], []>} : vector<16x128xf32>, vector<128x32xf32>, vector<16x32xf32> -> vector<16x32xf32>
    %19 = arith.addf %16, %18 : vector<16x32xf32>
    %c0_14 = arith.constant 0 : index
    %c0_15 = arith.constant 0 : index
    %20 = vector.load %arg9[%c0_14, %c0_15] : memref<16x32xf32, #tpu.memory_space<vmem>>, vector<16x32xf32>
    tpu.vector_store %arg9[%c0_14, %c0_15], %19 {strides = array<i32>} : memref<16x32xf32, #tpu.memory_space<vmem>>, vector<16x32xf32>,
    %c0_i32_16 = arith.constant 0 : i32
    %21 = arith.cmpi eq, %arg1, %c0_i32_16 : i32
    %22 = arith.extui %21 : i1 to i32
    %c0_i32_17 = arith.constant 0 : i32
    %23 = arith.cmpi ne, %22, %c0_i32_17 : i32
    scf.if %23 {
      %c0_18 = arith.constant 0 : index
      %c0_19 = arith.constant 0 : index
      %24 = vector.load %arg2[%c0_18, %c0_19] : memref<16x32xf32, #tpu.memory_space<vmem>>, vector<16x32xf32>
      %c0_20 = arith.constant 0 : index
      %c0_21 = arith.constant 0 : index
      %25 = vector.load %arg9[%c0_20, %c0_21] : memref<16x32xf32, #tpu.memory_space<vmem>>, vector<16x32xf32>
      %26 = arith.addf %24, %25 : vector<16x32xf32>
      %c0_22 = arith.constant 0 : index
      %c0_23 = arith.constant 0 : index
      %27 = vector.load %arg7[%c0_22, %c0_23] : memref<16x32xf32, #tpu.memory_space<vmem>>, vector<16x32xf32>
      tpu.vector_store %arg7[%c0_22, %c0_23], %26 {strides = array<i32>} : memref<16x32xf32, #tpu.memory_space<vmem>>, vector<16x32xf32>,
    } else {
    }
    return
  }
  func.func @transform_0(%arg0: i32, %arg1: i32) -> (i32, i32) {
    %c0_i32 = arith.constant 0 : i32
    %c0_i32_0 = arith.constant 0 : i32
    return %arg0, %c0_i32 : i32, i32
  }
  func.func @transform_1(%arg0: i32, %arg1: i32) -> (i32, i32) {
    %c0_i32 = arith.constant 0 : i32
    %c0_i32_0 = arith.constant 0 : i32
    return %c0_i32, %arg1 : i32, i32
  }
  func.func @transform_2(%arg0: i32, %arg1: i32) -> (i32, i32) {
    %c0_i32 = arith.constant 0 : i32
    %c0_i32_0 = arith.constant 0 : i32
    return %c0_i32, %arg1 : i32, i32
  }
  func.func @transform_3(%arg0: i32, %arg1: i32) -> (i32, i32) {
    %c0_i32 = arith.constant 0 : i32
    %c0_i32_0 = arith.constant 0 : i32
    return %arg1, %c0_i32 : i32, i32
  }
  func.func @transform_4(%arg0: i32, %arg1: i32) -> (i32, i32) {
    %c0_i32 = arith.constant 0 : i32
    %c0_i32_0 = arith.constant 0 : i32
    %c0_i32_1 = arith.constant 0 : i32
    return %c0_i32, %c0_i32_0 : i32, i32
  }
  func.func @transform_5(%arg0: i32, %arg1: i32) -> (i32, i32) {
    %c0_i32 = arith.constant 0 : i32
    %c0_i32_0 = arith.constant 0 : i32
    return %arg0, %c0_i32 : i32, i32
  }
}

</mosaic_0001>

<bundles_post_ra>
// kernel: transformer_block_forward.6
= control target key start
LH: loop header
LB: loop body
LE: loop exit
PB: predicated region body
PF: predicated region fallthrough
CT: control target
= control target key end

     0   :  { %vm18_vm0 = vcmask 261120   ;;  %v158_v3 = vmov 0.0   ;;  %s217_s1 = inlined_call_operand.vmem [shape: f32[32,32], index: 1, kind: input, shape index: {}]   ;;  %s218_s0 = inlined_call_operand.vmem [shape: f32[16,32], index: 0, kind: input, shape index: {}]   ;;  %s219_s2 = inlined_call_operand.vmem [shape: f32[16,32], index: 2, kind: input, shape index: {}]   ;;  %s220_s3 = inlined_call_operand.vmem [shape: f32[16,32], index: 3, kind: output, shape index: {}]  }
   0x1   :  { %v25_v0 = vld [vmem:[%s217_s1] sm:$0xff]  ;;  %v26_v1 = vld [vmem:[%s217_s1 + $0x8] sm:$0xff]  ;;  %v27_v2 = vld [vmem:[%s217_s1 + $0x10] sm:$0xff]  ;;  %20 = vst.msk [vmem:[#allocation2 + $0x8] sm:$0xff] %vm18_vm0, %v158_v3 }
   0x2   :  { %19 = vst.msk [vmem:[#allocation2] sm:$0xff] %vm18_vm0, %v158_v3  ;;  %v149_v4 = vpack.c.bf16 %v26_v1, %v25_v0  ;;  %v28_v5 = vld [vmem:[%s217_s1 + $0x18] sm:$0xff]  ;;  %v23_v6 = vld [vmem:[%s218_s0] sm:$0xff]  ;;  %v24_v8 = vld [vmem:[%s218_s0 + $0x8] sm:$0xff] }
   0x3   :  { %v153_v7 = vpack.c.bf16 %v28_v5, %v27_v2  ;;  %146 = vmatprep.mubr.msk.f32.mxu0 %vm18_vm0, %v23_v6  ;;  %v121_v15 = vld [vmem:[%s219_s2 + $0x8] sm:$0xff]  ;;  %v120_v16 = vld [vmem:[%s219_s2] sm:$0xff] }
   0x4   :  { %150 = vmatprep.subr.bf16.mxu0 %v149_v4 }
   0x5   :  { %152 = vmatpush3.bf16.msra.mxu0 %v149_v4 }
   0x6   :  { %154 = vmatprep.subr.bf16.mxu0 %v153_v7 }
   0x8   :  { %v22_v9 = vld [vmem:[#allocation2 + $0x8] sm:$0xff] }
   0x9   :  { %156 = vmatpush3.bf16.msra.mxu0 %v153_v7  ;;  %v21_v10 = vld [vmem:[#allocation2] sm:$0xff] }
   0xc   :  { %147 = vmatmul.mubr.msk.f32.vlgmr.msra.gmra.mrb[0].mxu0 %vm18_vm0, %v24_v8 }
  0xdf   :  { %v148_v11 = vpop.f32.mrb[0].mxu0 }
  0xe0   :  { %v112_v12 = vadd.f32 %v148_v11, %v22_v9  ;;  %v102_v13 = vpop.f32.mrb[1].mxu0 }
  0xe1   :  { %v111_v14 = vadd.f32 %v102_v13, %v21_v10 }
  0xe2   :  { %114 = vst.msk [vmem:[#allocation2 + $0x8] sm:$0xff] %vm18_vm0, %v112_v12 }
  0xe3   :  { %113 = vst.msk [vmem:[#allocation2] sm:$0xff] %vm18_vm0, %v111_v14 }
  0xe9   :  { %v119_v17 = vld [vmem:[#allocation2 + $0x8] sm:$0xff] }
  0xea   :  { %v123_v18 = vadd.f32 %v121_v15, %v119_v17  ;;  %v118_v19 = vld [vmem:[#allocation2] sm:$0xff] }
  0xeb   :  { %v122_v20 = vadd.f32 %v120_v16, %v118_v19 }
  0xec   :  { %125 = vst.msk [vmem:[%s220_s3 + $0x8] sm:$0xff] %vm18_vm0, %v123_v18 }
  0xed   :  { %124 = vst.msk [vmem:[%s220_s3] sm:$0xff] %vm18_vm0, %v122_v20 }

// kernel: transformer_block_forward.4
= control target key start
LH: loop header
LB: loop body
LE: loop exit
PB: predicated region body
PF: predicated region fallthrough
CT: control target
= control target key end

     0   :  { %vm31_vm0 = vcmask 261120   ;;  %vm227_vm1 = vcmask 130048   ;;  %s524_s0 = inlined_call_operand.vmem [shape: f32[16,32], index: 0, kind: input, shape index: {}]   ;;  %s525_s1 = inlined_call_operand.vmem [shape: f32[32,32], index: 1, kind: input, shape index: {}]   ;;  %s526_s2 = inlined_call_operand.vmem [shape: f32[32,16], index: 2, kind: input, shape index: {}]   ;;  %s527_s3 = inlined_call_operand.vmem [shape: f32[32,16], index: 3, kind: input, shape index: {}]   ;;  %s528_s4 = inlined_call_operand.vmem [shape: f32[1,32], index: 4, kind: input, shape index: {}]   ;;  %s529_s5 = inlined_call_operand.vmem [shape: f32[16,32], index: 5, kind: output, shape index: {0}]   ;;  %s530_s6 = inlined_call_operand.vmem [shape: f32[16,16], index: 6, kind: output, shape index: {1}]   ;;  %s531_s7 = inlined_call_operand.vmem [shape: f32[16,16], index: 7, kind: output, shape index: {2}]  }
   0x1   :  { %v27_v0 = vld [vmem:[%s524_s0] sm:$0xff]  ;;  %v28_v1 = vld [vmem:[%s524_s0 + $0x8] sm:$0xff]  ;;  %v62_v12 = vld [vmem:[%s525_s1 + $0x10] sm:$0xff] }
   0x2   :  { %v29_v2 = vmul.f32 %v27_v0, %v27_v0  ;;  %v30_v3 = vmul.f32 %v28_v1, %v28_v1  ;;  %v60_v6 = vld [vmem:[%s525_s1] sm:$0xff]  ;;  %v61_v7 = vld [vmem:[%s525_s1 + $0x8] sm:$0xff]  ;;  %v63_v13 = vld [vmem:[%s525_s1 + $0x18] sm:$0xff] }
   0x3   :  { %v381_v8 = vpack.c.bf16 %v61_v7, %v60_v6  ;;  %v148_v9 = vld [vmem:[%s526_s2] sm:$0xff]  ;;  %v149_v10 = vld [vmem:[%s526_s2 + $0x8] sm:$0xff]  ;;  %v385_v14 = vpack.c.bf16 %v63_v13, %v62_v12  ;;  %v150_v15 = vld [vmem:[%s526_s2 + $0x10] sm:$0xff] }
   0x4   :  { %v32_v4 = vsel %vm31_vm0, %v29_v2, 0.0  ;;  %v35_v5 = vsel %vm31_vm0, %v30_v3, 0.0  ;;  %v389_v11 = vpack.c.bf16 %v149_v10, %v148_v9  ;;  %v151_v16 = vld [vmem:[%s526_s2 + $0x18] sm:$0xff]  ;;  %v230_v18 = vld [vmem:[%s527_s3] sm:$0xff]  ;;  %v231_v19 = vld [vmem:[%s527_s3 + $0x8] sm:$0xff] }
   0x5   :  { %33 = vadd.xlane.f32.xlu0 %v32_v4  ;;  %382 = vmatprep.subr.bf16.mxu0 %v381_v8  ;;  %v393_v17 = vpack.c.bf16 %v151_v16, %v150_v15  ;;  %v397_v20 = vpack.c.bf16 %v231_v19, %v230_v18  ;;  %v323_v28 = vld [vmem:[%s528_s4] ss:$0 sm:$0xff]  ;;  %v232_v35 = vld [vmem:[%s527_s3 + $0x10] sm:$0xff]  ;;  %v233_v36 = vld [vmem:[%s527_s3 + $0x18] sm:$0xff] }
   0x6   :  { %384 = vmatpush3.bf16.msra.mxu0 %v381_v8  ;;  %390 = vmatprep.subr.bf16.mxu1 %v389_v11  ;;  %v401_v37 = vpack.c.bf16 %v233_v36, %v232_v35 }
   0x7   :  { %392 = vmatpush3.bf16.msra.mxu1 %v389_v11  ;;  %386 = vmatprep.subr.bf16.mxu0 %v385_v14 }
   0x8   :  { %394 = vmatprep.subr.bf16.mxu1 %v393_v17 }
   0x9   :  { %36 = vadd.xlane.f32.xlu0 %v35_v5 }
   0xa   :  { %388 = vmatpush3.bf16.msra.mxu0 %v385_v14 }
   0xb   :  { %396 = vmatpush3.bf16.msra.mxu1 %v393_v17  ;;  %398 = vmatprep.subr.bf16.mxu0 %v397_v20 }
  0x92   :  { %v34_v21 = vpop.xlane.xlu0 %33 }
  0x93   :  { %v39_v22 = vmul.f32 0.03125, %v34_v21 }
  0x95   :  { %v41_v23 = vadd.f32 1e-06, %v39_v22 }
  0x96   :  { %v37_v24 = vpop.xlane.xlu0 %36 }
  0x97   :  { %405 = vrsqrt.f32 %v41_v23  ;;  %v40_v25 = vmul.f32 0.03125, %v37_v24 }
  0x99   :  { %v42_v26 = vadd.f32 1e-06, %v40_v25 }
  0x9b   :  { %407 = vrsqrt.f32 %v42_v26 }
  0xa1   :  { %v406_v27 = vpop.eup %405 }
  0xa2   :  { %v45_v29 = vmul.f32 %v406_v27, %v27_v0 }
  0xa4   :  { %v54_v30 = vmul.f32 %v323_v28, %v45_v29 }
  0xa5   :  { %v408_v31 = vpop.eup %407 }
  0xa6   :  { %56 = vst.msk [vmem:[#allocation2] sm:$0xff] %vm31_vm0, %v54_v30  ;;  %v46_v32 = vmul.f32 %v408_v31, %v28_v1 }
  0xa8   :  { %v55_v33 = vmul.f32 %v323_v28, %v46_v32 }
  0xaa   :  { %57 = vst.msk [vmem:[#allocation2 + $0x8] sm:$0xff] %vm31_vm0, %v55_v33 }
  0xad   :  { %v58_v34 = vld [vmem:[#allocation2] sm:$0xff] }
  0xae   :  { %356 = vmatprep.mubr.msk.f32.mxu0 %vm31_vm0, %v58_v34  ;;  %367 = vmatprep.mubr.msk.f32.mxu1 %vm31_vm0, %v58_v34 }
  0xb1   :  { %v59_v38 = vld [vmem:[#allocation2 + $0x8] sm:$0xff] }
  0xb2   :  { %357 = vmatmul.mubr.msk.f32.vlgmr.msra.gmra.mrb[0].mxu0 %vm31_vm0, %v59_v38  ;;  %368 = vmatmul.mubr.msk.f32.vlgmr.msra.gmra.mrb[0].mxu1 %vm31_vm0, %v59_v38 }
  0xb3   :  { %400 = vmatpush3.bf16.msra.mxu0 %v397_v20  ;;  %378 = vmatprep.mubr.msk.f32.mxu0 %vm31_vm0, %v58_v34 }
  0xb4   :  { %402 = vmatprep.subr.bf16.mxu0 %v401_v37 }
  0xb7   :  { %404 = vmatpush3.bf16.msra.mxu0 %v401_v37 }
  0xba   :  { %379 = vmatmul.mubr.msk.f32.vlgmr.msra.gmra.mrb[2].mxu0 %vm31_vm0, %v59_v38 }
 0x185   :  { %v358_v39 = vpop.f32.mrb[0].mxu0  ;;  %v369_v40 = vpop.f32.mrb[0].mxu1 }
 0x186   :  { %147 = vst.msk [vmem:[%s529_s5 + $0x8] sm:$0xff] %vm31_vm0, %v358_v39  ;;  %v137_v41 = vpop.f32.mrb[1].mxu0  ;;  %v218_v42 = vpop.f32.mrb[1].mxu1 }
 0x187   :  { %229 = vst.msk [vmem:[%s530_s6 + $0x8] sm:$0xff] %vm227_vm1, %v369_v40  ;;  %228 = vst.msk [vmem:[%s530_s6] sm:$0xff] %vm227_vm1, %v218_v42 }
 0x188   :  { %146 = vst.msk [vmem:[%s529_s5] sm:$0xff] %vm31_vm0, %v137_v41 }
 0x18d   :  { %v380_v43 = vpop.f32.mrb[2].mxu0 }
 0x18e   :  { %310 = vst.msk [vmem:[%s531_s7 + $0x8] sm:$0xff] %vm227_vm1, %v380_v43  ;;  %v300_v44 = vpop.f32.mrb[3].mxu0 }
 0x18f   :  { %309 = vst.msk [vmem:[%s531_s7] sm:$0xff] %vm227_vm1, %v300_v44 }

// kernel: transformer_block_forward.5
= control target key start
LH: loop header
LB: loop body
LE: loop exit
PB: predicated region body
PF: predicated region fallthrough
CT: control target
= control target key end

     0   :  { %s1374_s12 = smov 0   ;;  %s1376_s13 = smov 0   ;;  %s1514_s0 = inlined_call_operand.vmem [shape: f32[2,8,32], index: 0, kind: input, shape index: {}]   ;;  %s1515_s1 = inlined_call_operand.vmem [shape: f32[2,8,16], index: 1, kind: input, shape index: {}]   ;;  %s1516_s2 = inlined_call_operand.vmem [shape: f32[2,8,16], index: 2, kind: input, shape index: {}]   ;;  %s1517_s3 = inlined_call_operand.vmem [shape: f32[2,8,32], index: 3, kind: output, shape index: {}]  }
   0x1   :  { %s1378_s14 = smov 0  }
   0x2 LB: > { %s32_s15 = sadd.s32 1, %s1338_s13  ;;  %p1185_p0 = scmp.ge.s32.totalorder %s1342_s14, 1  ;;  %s1342_s14 = sphi %s1378_s14, %s13_s14   ;;  %s1338_s13 = sphi %s1376_s13, %s1519_s13   ;;  %s1334_s12 = sphi %s1374_s12, %s1518_s12  }
   0x3   : > { %p34_p1 = scmp.ge.s32.totalorder %s32_s15, 2  ;;  %p190_p2 = scmp.lt.s32.totalorder %s1342_s14, 3 }
   0x5   : > { %s1521_s15 = smov (%p34_p1, %s32_s15), 0  ;;  %p191_p3 = pnand %p1185_p0, %p190_p2 }
   0x6   : > { %p232_p4 = scmp.lt.s32.totalorder (!%p191_p3), %s1334_s12, 1  ;;  %v1344_v0 = vmov (!%p191_p3), 0.0   ;;  %vm1345_vm0 = vmmov (!%p191_p3), 0   ;;  %vm278_vm1 = vcmask (!%p191_p3), 64512   ;;  %vm264_vm2 = vcmask (!%p191_p3), 7168   ;;  %s1348_s23 = smov (!%p191_p3), 120  }
   0x7   : > { %194 = sbr.rel (%p191_p3) target bundleno = 1401 (0x579), region = 32  ;;  %1220 = vmatprep.subr.mxu0 (!%p191_p3), %v1344_v0  ;;  %1222 = vmatprep.mubr.msk.f32.mxu0 (!%p191_p3), %vm1345_vm0, %v1344_v0  ;;  %v1346_v3 = vmov (!%p191_p3), -inf   ;;  %269 = vst.msk [vmem:[#allocation3] sm:$0xff] (!%p191_p3), %vm264_vm2, %v1344_v0  ;;  %270 = vst.msk [vmem:[#allocation3 + $0x8] sm:$0xff] (!%p191_p3), %vm264_vm2, %v1344_v0  ;;  %v1347_v7 = vmov (!%p191_p3), 0   ;;  %s1349_s24 = smov (!%p191_p3), 112  }
   0x8   : > { %1225 = vmatprep.subr.mxu1 (!%p191_p3), %v1344_v0  ;;  %1227 = vmatprep.mubr.msk.f32.mxu1 (!%p191_p3), %vm1345_vm0, %v1344_v0  ;;  %265 = vst.msk [vmem:[#allocation2] sm:$0xff] (!%p191_p3), %vm264_vm2, %v1346_v3  ;;  %266 = vst.msk [vmem:[#allocation2 + $0x8] sm:$0xff] (!%p191_p3), %vm264_vm2, %v1346_v3  ;;  %s1350_s25 = smov (!%p191_p3), 104   ;;  %vm273_vm3 = vcmask (!%p191_p3), 261120   ;;  %s1351_s29 = smov (!%p191_p3), 8   ;;  %vm654_vm4 = vcmask (!%p191_p3), 130112  }
   0x9   : > { %267 = vst.msk [vmem:[#allocation2 + $0x10] sm:$0xff] (!%p191_p3), %vm264_vm2, %v1346_v3  ;;  %268 = vst.msk [vmem:[#allocation2 + $0x18] sm:$0xff] (!%p191_p3), %vm264_vm2, %v1346_v3  ;;  %1294 = vset.pattern.permute.xlu0 (!%p191_p3), %v1347_v7  ;;  %1295 = vset.pattern.permute.xlu1 (!%p191_p3), %v1347_v7  ;;  %s1352_s30 = smov (!%p191_p3), 16   ;;  %s1353_s4 = smov (!%p191_p3), 24   ;;  %vm841_vm5 = vcmask (!%p191_p3), 195712   ;;  %vm1028_vm6 = vcmask (!%p191_p3), 261312  }
   0xa   : > { %271 = vst.msk [vmem:[#allocation3 + $0x10] sm:$0xff] (!%p191_p3), %vm264_vm2, %v1344_v0  ;;  %272 = vst.msk [vmem:[#allocation3 + $0x18] sm:$0xff] (!%p191_p3), %vm264_vm2, %v1344_v0 }
   0xb   : > { %274 = vst.msk [vmem:[#allocation4] sm:$0xff] (!%p191_p3), %vm273_vm3, %v1344_v0 }
   0xe   : > { %s1523_s12 = smov (!%p232_p4, %s1334_s12), 1 }
   0xf   : > { %s1398_s16 = sshll.u32 %s1523_s12, 3  ;;  %v355_v8 = vld [vmem:[#allocation2] sm:$0xff]  ;;  %v541_v32 = vld [vmem:[#allocation2 + $0x8] sm:$0xff] }
  0x10   : > { %s245_s19 = scalar_lea.vmem %s1515_s1, %s1398_s16  ;;  %s238_s22 = scalar_lea.vmem %s1514_s0, %s1398_s16  ;;  %v1457_v36 = vld [vmem:[#allocation2 + $0x10] sm:$0xff]  ;;  %v1463_v39 = vld [vmem:[#allocation2 + $0x18] sm:$0xff] }
  0x11   : > { %v276_v1 = vld [vmem:[%s245_s19] sm:$0xff]  ;;  %s252_s28 = scalar_lea.vmem %s1516_s2, %s1398_s16  ;;  %s259_s7 = scalar_lea.vmem %s1517_s3, %s1398_s16 }
  0x12   : > { %1221 = vmatpush3.xpose.msk.msra.mxu0 %vm278_vm1, %v276_v1  ;;  %v275_v2 = vld [vmem:[%s238_s22] sm:$0xff]  ;;  %464 = vrot.lane.b32.xlu1 %v276_v1, %s1348_s23 }
  0x13   : > { %1235 = vmatprep.subr.mxu0 %v1344_v0  ;;  %v1433_v12 = vld [vmem:[%s252_s28] sm:$0xff] }
  0x14   : > { %1226 = vmatpush3.msra.mxu1 %v1433_v12  ;;  %v452_v58 = vld [vmem:[#allocation4] sm:$0xff] }
  0x15   : > { %1223 = vmatmul.mubr.msk.f32.vlgmr.msra.gmra.mrb[0].mxu0 %vm278_vm1, %v275_v2  ;;  %1230 = vmatprep.subr.mxu1 %v1344_v0 }
  0x16   : > { %1237 = vmatprep.mubr.msk.f32.mxu0 %vm1345_vm0, %v1344_v0  ;;  %462 = vrot.lane.b32.xlu1 %v275_v2, %s1348_s23 }
  0x1a   : > { %657 = vrot.lane.b32.xlu1 %v275_v2, %s1349_s24 }
  0x1e   : > { %844 = vrot.lane.b32.xlu1 %v275_v2, %s1350_s25 }
  0x84   : > { %v465_v16 = vpop.permute.xlu1 %464 }
  0x88   : > { %v463_v17 = vpop.permute.xlu1 %462 }
  0x8c   : > { %v658_v19 = vpop.permute.xlu1 %657 }
  0x90   : > { %v845_v20 = vpop.permute.xlu1 %844 }
  0xe8   : > { %v351_v4 = vpop.f32.mrb[0].mxu0 }
  0xe9   : > { %v1224_v5 = vpop.f32.mrb[1].mxu0  ;;  %v356_v6 = vsel %vm278_vm1, %v351_v4, -inf }
  0xea   : > { %357 = vmax.xlane.f32.xlu0 %v356_v6  ;;  %v371_v6 = vld [vmem:[#allocation3] sm:$0xff] }
 0x177   : > { %v358_v9 = vpop.xlane.xlu0 %357 }
 0x178   : > { %v359_v10 = vmax.f32 %v355_v8, %v358_v9 }
 0x17a   : > { %v360_v11 = vsub.f32 %v355_v8, %v359_v10  ;;  %461 = vst.msk [vmem:[#allocation2] sm:$0xff] %vm264_vm2, %v359_v10  ;;  %365 = vperm.xlu0 %1294, %v359_v10  }
 0x17c   : > { %v361_v33 = vmul.f32 1.442695, %v360_v11 }
 0x1f9   : > { %v366_v13 = vpop.permute.xlu0 %365 }
 0x1fa   : > { %v368_v14 = vsub.f32 %v351_v4, %v366_v13 }
 0x1fc   : > { %v369_v15 = vmul.f32 1.442695, %v368_v14 }
 0x1fe   : > { %1296 = vpow2.f32 %v369_v15 }
 0x1ff   : > { %1298 = vpow2.f32 %v361_v33 }
 0x208   : > { %v1297_v18 = vpop.eup %1296 }
 0x209   : > { %1228 = vmatmul.mubr.msk.f32.vlgmr.msra.gmra.mrb[0].mxu1 %vm278_vm1, %v1297_v18  ;;  %v1299_v44 = vpop.eup %1298  ;;  %v373_v46 = vsel %vm278_vm1, %v1297_v18, 0.0 }
 0x20a   : > { %1231 = vmatpush3.xpose.msk.msra.mxu1 %vm278_vm1, %v465_v16  ;;  %1232 = vmatprep.mubr.msk.f32.mxu1 %vm1345_vm0, %v1344_v0  ;;  %v372_v7 = vmul.f32 %v1299_v44, %v371_v6 }
 0x20b   : > { %1240 = vmatprep.subr.mxu1 %v1344_v0 }
 0x20d   : > { %1233 = vmatmul.mubr.msk.f32.vlgmr.msra.gmra.mrb[2].mxu1 %vm278_vm1, %v463_v17 }
 0x20e   : > { %1241 = vmatpush3.xpose.msk.msra.mxu1 %vm278_vm1, %v276_v1  ;;  %1242 = vmatprep.mubr.msk.f32.mxu1 %vm1345_vm0, %v1344_v0 }
 0x20f   : > { %1250 = vmatprep.subr.mxu1 %v1344_v0 }
 0x211   : > { %1243 = vmatmul.mubr.msk.f32.vlgmr.msra.gmra.mrb[4].mxu1 %vm278_vm1, %v658_v19 }
 0x212   : > { %1251 = vmatpush3.xpose.msk.msra.mxu1 %vm278_vm1, %v465_v16  ;;  %1252 = vmatprep.mubr.msk.f32.mxu1 %vm1345_vm0, %v1344_v0  ;;  %v749_v16 = vld [vmem:[#allocation3 + $0x10] sm:$0xff] }
 0x215   : > { %1253 = vmatmul.mubr.msk.f32.vlgmr.msra.gmra.mrb[6].mxu1 %vm278_vm1, %v845_v20 }
 0x2dc   : > { %v1452_v21 = vpop.f32.mrb[0].mxu1 }
 0x2dd   : > { %v1229_v22 = vpop.f32.mrb[1].mxu1 }
 0x2e0   : > { %v536_v23 = vpop.f32.mrb[2].mxu1 }
 0x2e1   : > { %v1234_v24 = vpop.f32.mrb[3].mxu1  ;;  %v542_v25 = vsel %vm278_vm1, %v536_v23, -inf }
 0x2e2   : > { %543 = vmax.xlane.f32.xlu1 %v542_v25 }
 0x2e4   : > { %v727_v26 = vpop.f32.mrb[4].mxu1 }
 0x2e5   : > { %v733_v27 = vsel %vm278_vm1, %v727_v26, -inf  ;;  %v1244_v28 = vpop.f32.mrb[5].mxu1 }
 0x2e6   : > { %734 = vmax.xlane.f32.xlu0 %v733_v27 }
 0x2e8   : > { %v914_v29 = vpop.f32.mrb[6].mxu1 }
 0x2e9   : > { %v920_v30 = vsel %vm278_vm1, %v914_v29, -inf  ;;  %v1254_v31 = vpop.f32.mrb[7].mxu1 }
 0x2ea   : > { %921 = vmax.xlane.f32.xlu1 %v920_v30 }
 0x36f   : > { %v544_v34 = vpop.xlane.xlu1 %543 }
 0x370   : > { %v545_v35 = vmax.f32 %v541_v32, %v544_v34 }
 0x372   : > { %656 = vst.msk [vmem:[#allocation2 + $0x8] sm:$0xff] %vm264_vm2, %v545_v35  ;;  %551 = vperm.xlu1 %1295, %v545_v35   ;;  %v546_v45 = vsub.f32 %v541_v32, %v545_v35 }
 0x373   : > { %v735_v37 = vpop.xlane.xlu0 %734 }
 0x374   : > { %v1461_v38 = vmax.f32 %v1457_v36, %v735_v37  ;;  %v547_v47 = vmul.f32 1.442695, %v546_v45 }
 0x376   : > { %v737_v40 = vsub.f32 %v1457_v36, %v1461_v38  ;;  %843 = vst.msk [vmem:[#allocation2 + $0x10] sm:$0xff] %vm264_vm2, %v1461_v38  ;;  %742 = vperm.xlu1 %1295, %v1461_v38   ;;  %1300 = vpow2.f32 %v547_v47 }
 0x377   : > { %v922_v41 = vpop.xlane.xlu1 %921 }
 0x378   : > { %v923_v42 = vmax.f32 %v1463_v39, %v922_v41  ;;  %v738_v10 = vmul.f32 1.442695, %v737_v40 }
 0x37a   : > { %v924_v43 = vsub.f32 %v1463_v39, %v923_v42  ;;  %1030 = vst.msk [vmem:[#allocation2 + $0x18] sm:$0xff] %vm264_vm2, %v923_v42  ;;  %566 = vrot.lane.b32.xlu1 %v1433_v12, %s1348_s23  ;;  %929 = vperm.xlu0 %1294, %v923_v42  }
 0x37c   : > { %v925_v11 = vmul.f32 1.442695, %v924_v43 }
 0x37e   : > { %455 = vperm.xlu0 %1294, %v1299_v44  }
 0x380   : > { %v1301_v48 = vpop.eup %1300 }
 0x39e   : > { %374 = vadd.xlane.f32.xlu1 %v373_v46 }
 0x3af   : > { %645 = vperm.xlu1 %1295, %v1301_v48  }
 0x3f1   : > { %v552_v49 = vpop.permute.xlu1 %551 }
 0x3f2   : > { %v554_v50 = vsub.f32 %v536_v23, %v552_v49 }
 0x3f4   : > { %v555_v51 = vmul.f32 1.442695, %v554_v50 }
 0x3f5   : > { %v743_v52 = vpop.permute.xlu1 %742 }
 0x3f6   : > { %1302 = vpow2.f32 %v555_v51  ;;  %v745_v53 = vsub.f32 %v727_v26, %v743_v52 }
 0x3f8   : > { %v746_v54 = vmul.f32 1.442695, %v745_v53 }
 0x3f9   : > { %v930_v55 = vpop.permute.xlu0 %929  ;;  %v567_v56 = vpop.permute.xlu1 %566 }
 0x3fa   : > { %1304 = vpow2.f32 %v746_v54  ;;  %v932_v57 = vsub.f32 %v914_v29, %v930_v55  ;;  %1236 = vmatpush3.msra.mxu0 %v567_v56 }
 0x3fb   : > { %1245 = vmatprep.subr.mxu0 %v1344_v0 }
 0x3fc   : > { %v933_v59 = vmul.f32 1.442695, %v932_v57 }
 0x3fd   : > { %v456_v60 = vpop.permute.xlu0 %455 }
 0x3fe   : > { %1306 = vpow2.f32 %v933_v59  ;;  %v458_v61 = vmul.f32 %v456_v60, %v452_v58 }
 0x3ff   : > { %1308 = vpow2.f32 %v738_v10 }
 0x400   : > { %v1303_v62 = vpop.eup %1302  ;;  %v459_v63 = vadd.f32 %v458_v61, %v1452_v21  ;;  %1310 = vpow2.f32 %v925_v11  ;;  %v936_v21 = vld [vmem:[#allocation3 + $0x18] sm:$0xff] }
 0x401   : > { %1238 = vmatmul.mubr.msk.f32.vlgmr.msra.gmra.mrb[2].mxu0 %vm278_vm1, %v1303_v62  ;;  %v560_v1 = vsel %vm278_vm1, %v1303_v62, 0.0 }
 0x402   : > { %460 = vst.msk [vmem:[#allocation4] sm:$0xff] %vm278_vm1, %v459_v63  ;;  %561 = vadd.xlane.f32.xlu0 %v560_v1  ;;  %1246 = vmatpush3.msra.mxu0 %v1433_v12  ;;  %v558_v12 = vld [vmem:[#allocation3 + $0x8] sm:$0xff] }
 0x403   : > { %1247 = vmatprep.mubr.msk.f32.mxu0 %vm1345_vm0, %v1344_v0  ;;  %1255 = vmatprep.subr.mxu0 %v1344_v0  ;;  %v559_v13 = vmul.f32 %v1301_v48, %v558_v12 }
 0x404   : > { %v1305_v2 = vpop.eup %1304 }
 0x405   : > { %1248 = vmatmul.mubr.msk.f32.vlgmr.msra.gmra.mrb[4].mxu0 %vm278_vm1, %v1305_v2  ;;  %v751_v3 = vsel %vm278_vm1, %v1305_v2, 0.0 }
 0x406   : > { %1256 = vmatpush3.msra.mxu0 %v567_v56  ;;  %752 = vadd.xlane.f32.xlu1 %v751_v3 }
 0x407   : > { %1257 = vmatprep.mubr.msk.f32.mxu0 %vm1345_vm0, %v1344_v0 }
 0x408   : > { %v1307_v4 = vpop.eup %1306 }
 0x409   : > { %1258 = vmatmul.mubr.msk.f32.vlgmr.msra.gmra.mrb[6].mxu0 %vm278_vm1, %v1307_v4  ;;  %v938_v5 = vsel %vm278_vm1, %v1307_v4, 0.0  ;;  %v1309_v14 = vpop.eup %1308  ;;  %v642_v40 = vld [vmem:[#allocation4] sm:$0xff] }
 0x40a   : > { %939 = vadd.xlane.f32.xlu0 %v938_v5  ;;  %v750_v18 = vmul.f32 %v1309_v14, %v749_v16  ;;  %v1311_v19 = vpop.eup %1310 }
 0x40b   : > { %v937_v23 = vmul.f32 %v1311_v19, %v936_v21 }
 0x42b   : > { %v375_v8 = vpop.xlane.xlu1 %374 }
 0x42c   : > { %v376_v9 = vadd.f32 %v375_v8, %v372_v7 }
 0x42e   : > { %378 = vst.msk [vmem:[#allocation3] sm:$0xff] %vm264_vm2, %v376_v9 }
 0x42f   : > { %v646_v0 = vpop.permute.xlu1 %645 }
 0x430   : > { %v648_v41 = vmul.f32 %v646_v0, %v642_v40 }
 0x435   : > { %v1034_v28 = vld [vmem:[#allocation3] sm:$0xff] }
 0x436   : > { %1312 = vrcp.f32 %v1034_v28 }
 0x440   : > { %v1313_v36 = vpop.eup %1312 }
 0x48f   : > { %v562_v15 = vpop.xlane.xlu0 %561 }
 0x490   : > { %v563_v17 = vadd.f32 %v562_v15, %v559_v13 }
 0x492   : > { %564 = vst.msk [vmem:[#allocation3 + $0x8] sm:$0xff] %vm264_vm2, %v563_v17 }
 0x493   : > { %v753_v20 = vpop.xlane.xlu1 %752 }
 0x494   : > { %v754_v22 = vadd.f32 %v753_v20, %v750_v18 }
 0x496   : > { %755 = vst.msk [vmem:[#allocation3 + $0x10] sm:$0xff] %vm264_vm2, %v754_v22 }
 0x497   : > { %v940_v24 = vpop.xlane.xlu0 %939 }
 0x498   : > { %v941_v25 = vadd.f32 %v940_v24, %v937_v23 }
 0x499   : > { %v1044_v31 = vld [vmem:[#allocation3 + $0x8] sm:$0xff] }
 0x49a   : > { %942 = vst.msk [vmem:[#allocation3 + $0x18] sm:$0xff] %vm264_vm2, %v941_v25  ;;  %1314 = vrcp.f32 %v1044_v31 }
 0x49d   : > { %v1054_v34 = vld [vmem:[#allocation3 + $0x10] sm:$0xff] }
 0x49e   : > { %1316 = vrcp.f32 %v1054_v34 }
 0x4a1   : > { %v1064_v35 = vld [vmem:[#allocation3 + $0x18] sm:$0xff] }
 0x4a2   : > { %1318 = vrcp.f32 %v1064_v35 }
 0x4a4   : > { %v1315_v37 = vpop.eup %1314 }
 0x4a8   : > { %v1317_v38 = vpop.eup %1316 }
 0x4ac   : > { %v1319_v39 = vpop.eup %1318 }
 0x4d4   : > { %v638_v26 = vpop.f32.mrb[2].mxu0 }
 0x4d5   : > { %650 = vrot.lane.b32.xlu0 %v638_v26, %s1351_s29  ;;  %v1239_v27 = vpop.f32.mrb[3].mxu0 }
 0x4d8   : > { %v825_v29 = vpop.f32.mrb[4].mxu0 }
 0x4d9   : > { %832 = vperm.xlu0 %1294, %v1309_v14   ;;  %v1249_v30 = vpop.f32.mrb[5].mxu0 }
 0x4dc   : > { %v1012_v32 = vpop.f32.mrb[6].mxu0 }
 0x4dd   : > { %837 = vrot.lane.b32.xlu0 %v825_v29, %s1352_s30  ;;  %1024 = vrot.lane.b32.xlu1 %v1012_v32, %s1353_s4  ;;  %v1259_v33 = vpop.f32.mrb[7].mxu0 }
 0x4e1   : > { %1019 = vperm.xlu0 %1294, %v1311_v19  }
 0x4e5   : > { %1039 = vperm.xlu0 %1294, %v1313_v36  }
 0x4e9   : > { %1049 = vperm.xlu0 %1294, %v1315_v37  }
 0x4ed   : > { %1059 = vperm.xlu0 %1294, %v1317_v38  }
 0x4f1   : > { %1069 = vperm.xlu0 %1294, %v1319_v39  }
 0x547   : > { %v651_v42 = vpop.permute.xlu0 %650 }
 0x548   : > { %v653_v43 = vadd.f32 %v651_v42, %v648_v41 }
 0x54a   : > { %655 = vst.msk [vmem:[#allocation4] sm:$0xff] %vm654_vm4, %v653_v43 }
 0x54f   : > { %v1025_v53 = vpop.permute.xlu1 %1024 }
 0x551   : > { %v829_v45 = vld [vmem:[#allocation4] sm:$0xff] }
 0x558   : > { %v833_v44 = vpop.permute.xlu0 %832 }
 0x559   : > { %v835_v46 = vmul.f32 %v833_v44, %v829_v45 }
 0x55c   : > { %v838_v47 = vpop.permute.xlu0 %837 }
 0x55d   : > { %v840_v48 = vadd.f32 %v838_v47, %v835_v46 }
 0x55f   : > { %842 = vst.msk [vmem:[#allocation4] sm:$0xff] %vm841_vm5, %v840_v48 }
 0x560   : > { %v1020_v49 = vpop.permute.xlu0 %1019 }
 0x564   : > { %v1040_v50 = vpop.permute.xlu0 %1039 }
 0x566   : > { %v1016_v51 = vld [vmem:[#allocation4] sm:$0xff] }
 0x567   : > { %v1022_v52 = vmul.f32 %v1020_v49, %v1016_v51 }
 0x568   : > { %v1050_v55 = vpop.permute.xlu0 %1049 }
 0x569   : > { %v1027_v54 = vadd.f32 %v1025_v53, %v1022_v52 }
 0x56b   : > { %1029 = vst.msk [vmem:[#allocation4] sm:$0xff] %vm1028_vm6, %v1027_v54 }
 0x56c   : > { %v1060_v56 = vpop.permute.xlu0 %1059 }
 0x570   : > { %v1070_v61 = vpop.permute.xlu0 %1069 }
 0x572   : > { %v1036_v57 = vld [vmem:[#allocation4] sm:$0xff] }
 0x573   : > { %v1042_v58 = vmul.f32 %v1040_v50, %v1036_v57  ;;  %v1052_v59 = vmul.f32 %v1050_v55, %v1036_v57  ;;  %v1062_v60 = vmul.f32 %v1060_v56, %v1036_v57  ;;  %v1072_v62 = vmul.f32 %v1070_v61, %v1036_v57 }
 0x575   : > { %1043 = vst.msk [vmem:[%s259_s7] sm:$0xff] %vm278_vm1, %v1042_v58 }
 0x576   : > { %1053 = vst.msk [vmem:[%s259_s7] sm:$0xff] %vm654_vm4, %v1052_v59 }
 0x577   : > { %1063 = vst.msk [vmem:[%s259_s7] sm:$0xff] %vm841_vm5, %v1062_v60 }
 0x578   : > { %1073 = vst.msk [vmem:[%s259_s7] sm:$0xff] %vm1028_vm6, %v1072_v62 }
 0x579 PF: > { %s13_s14 = sadd.s32 1, %s1342_s14   ;;  %s1518_s12 = smov %s1338_s13 }
 0x57a   : > { %p10_p5 = scmp.ge.s32.totalorder %s13_s14, 4   ;;  %s1519_s13 = smov %s1521_s15 }
 0x57c   :  { %12 = sbr.rel (!%p10_p5) target bundleno = 2 (0x2), region = 82 }

// kernel: transformer_block_forward.7
= control target key start
LH: loop header
LB: loop body
LE: loop exit
PB: predicated region body
PF: predicated region fallthrough
CT: control target
= control target key end

     0   :  { %vm29_vm0 = vcmask 261120   ;;  %s696_s0 = inlined_call_operand.vmem [shape: f32[16,32], index: 0, kind: input, shape index: {}]   ;;  %s697_s1 = inlined_call_operand.vmem [shape: f32[32,128], index: 1, kind: input, shape index: {}]   ;;  %s698_s2 = inlined_call_operand.vmem [shape: f32[32,128], index: 2, kind: input, shape index: {}]   ;;  %s699_s3 = inlined_call_operand.vmem [shape: f32[128,32], index: 3, kind: input, shape index: {}]   ;;  %s700_s4 = inlined_call_operand.vmem [shape: f32[1,32], index: 4, kind: input, shape index: {}]   ;;  %s701_s5 = inlined_call_operand.hbm [shape: f32[16,32], index: 5, kind: output, shape index: {}]  }
   0x1   :  { %v580_v0 = vld [vmem:[%s696_s0] sm:$0xff]  ;;  %v585_v1 = vld [vmem:[%s696_s0 + $0x8] sm:$0xff] }
   0x2   :  { %v27_v2 = vmul.f32 %v580_v0, %v580_v0  ;;  %v28_v3 = vmul.f32 %v585_v1, %v585_v1 }
   0x3   :  { %10 = vsyncpa [#allocation5], 0  ;;  %v60_v6 = vld [vmem:[%s697_s1] sm:$0xff]  ;;  %v61_v7 = vld [vmem:[%s697_s1 + $0x8] sm:$0xff]  ;;  %v543_v57 = vmov 0.0  }
   0x4   :  { %v30_v4 = vsel %vm29_vm0, %v27_v2, 0.0  ;;  %v33_v5 = vsel %vm29_vm0, %v28_v3, 0.0  ;;  %v455_v8 = vpack.c.bf16 %v61_v7, %v60_v6  ;;  %v62_v9 = vld [vmem:[%s697_s1 + $0x10] sm:$0xff]  ;;  %v63_v10 = vld [vmem:[%s697_s1 + $0x18] sm:$0xff]  ;;  %v146_v12 = vld [vmem:[%s698_s2] sm:$0xff]  ;;  %57 = vst.msk [vmem:[#allocation3 + $0x8] sm:$0xff] %vm29_vm0, %v543_v57 }
   0x5   :  { %31 = vadd.xlane.f32.xlu0 %v30_v4  ;;  %v459_v11 = vpack.c.bf16 %v63_v10, %v62_v9  ;;  %v147_v13 = vld [vmem:[%s698_s2 + $0x8] sm:$0xff]  ;;  %v363_v22 = vld [vmem:[%s700_s4] ss:$0 sm:$0xff]  ;;  %v148_v29 = vld [vmem:[%s698_s2 + $0x10] sm:$0xff]  ;;  %56 = vst.msk [vmem:[#allocation3] sm:$0xff] %vm29_vm0, %v543_v57 }
   0x6   :  { %456 = vmatprep.subr.bf16.mxu1 %v455_v8  ;;  %v463_v14 = vpack.c.bf16 %v147_v13, %v146_v12  ;;  %v149_v30 = vld [vmem:[%s698_s2 + $0x18] sm:$0xff]  ;;  %v241_v33 = vld [vmem:[%s699_s3] sm:$0xff]  ;;  %v242_v34 = vld [vmem:[%s699_s3 + $0x8] sm:$0xff] }
   0x7   :  { %458 = vmatpush3.bf16.msra.mxu1 %v455_v8  ;;  %v467_v31 = vpack.c.bf16 %v149_v30, %v148_v29  ;;  %v471_v35 = vpack.c.bf16 %v242_v34, %v241_v33  ;;  %v243_v36 = vld [vmem:[%s699_s3 + $0x10] sm:$0xff]  ;;  %v244_v37 = vld [vmem:[%s699_s3 + $0x18] sm:$0xff]  ;;  %v245_v39 = vld [vmem:[%s699_s3 + $0x20] sm:$0xff] }
   0x8   :  { %460 = vmatprep.subr.bf16.mxu1 %v459_v11  ;;  %v475_v38 = vpack.c.bf16 %v244_v37, %v243_v36  ;;  %v246_v40 = vld [vmem:[%s699_s3 + $0x28] sm:$0xff]  ;;  %v247_v42 = vld [vmem:[%s699_s3 + $0x30] sm:$0xff]  ;;  %v248_v43 = vld [vmem:[%s699_s3 + $0x38] sm:$0xff] }
   0x9   :  { %34 = vadd.xlane.f32.xlu0 %v33_v5  ;;  %472 = vmatprep.subr.bf16.mxu0 %v471_v35  ;;  %v479_v41 = vpack.c.bf16 %v246_v40, %v245_v39  ;;  %v483_v44 = vpack.c.bf16 %v248_v43, %v247_v42  ;;  %v249_v45 = vld [vmem:[%s699_s3 + $0x40] sm:$0xff]  ;;  %v250_v46 = vld [vmem:[%s699_s3 + $0x48] sm:$0xff]  ;;  %v251_v48 = vld [vmem:[%s699_s3 + $0x50] sm:$0xff] }
   0xa   :  { %474 = vmatpush3.bf16.msra.mxu0 %v471_v35  ;;  %v487_v47 = vpack.c.bf16 %v250_v46, %v249_v45  ;;  %v252_v49 = vld [vmem:[%s699_s3 + $0x58] sm:$0xff]  ;;  %v253_v51 = vld [vmem:[%s699_s3 + $0x60] sm:$0xff]  ;;  %v254_v52 = vld [vmem:[%s699_s3 + $0x68] sm:$0xff] }
   0xb   :  { %462 = vmatpush3.bf16.msra.mxu1 %v459_v11  ;;  %476 = vmatprep.subr.bf16.mxu0 %v475_v38  ;;  %v491_v50 = vpack.c.bf16 %v252_v49, %v251_v48  ;;  %v495_v53 = vpack.c.bf16 %v254_v52, %v253_v51  ;;  %v255_v54 = vld [vmem:[%s699_s3 + $0x70] sm:$0xff]  ;;  %v256_v55 = vld [vmem:[%s699_s3 + $0x78] sm:$0xff]  ;;  %s544_s3 = smov [#allocation4]  }
   0xc   :  { %464 = vmatprep.subr.bf16.mxu1 %v463_v14  ;;  %v499_v56 = vpack.c.bf16 %v256_v55, %v255_v54  ;;  %s352_s15 = sshll.u32 %s544_s3, 4  ;;  %s353_s15 = int_to_ptr.vmem [resolvable:$true] %s352_s15 }
   0xd   :  { %s519_s2 = scalar_lea.vmem %s353_s15, 256  ;;  %p524_p1 = scmp.lt.s32.totalorder %s353_s15, %s353_s15 }
   0xe   :  { %478 = vmatpush3.bf16.msra.mxu0 %v475_v38  ;;  %p520_p0 = scmp.ne.s32.totalorder %s353_s15, %s519_s2  ;;  %p525_p2 = scmp.lt.s32.totalorder %s519_s2, %s519_s2 }
   0xf   :  { %480 = vmatprep.subr.bf16.mxu0 %v479_v41 }
  0x10   :  { %p526_p3 = por %p525_p2, %p524_p1 }
  0x12   :  { %482 = vmatpush3.bf16.msra.mxu0 %v479_v41  ;;  %p527_p4 = pnand %p526_p3, %p520_p0 }
  0x13   :  { %484 = vmatprep.subr.bf16.mxu0 %v483_v44 }
  0x16   :  { %486 = vmatpush3.bf16.msra.mxu0 %v483_v44 }
  0x17   :  { %488 = vmatprep.subr.bf16.mxu0 %v487_v47 }
  0x1a   :  { %490 = vmatpush3.bf16.msra.mxu0 %v487_v47 }
  0x1b   :  { %492 = vmatprep.subr.bf16.mxu0 %v491_v50 }
  0x1e   :  { %494 = vmatpush3.bf16.msra.mxu0 %v491_v50 }
  0x1f   :  { %496 = vmatprep.subr.bf16.mxu0 %v495_v53 }
  0x22   :  { %498 = vmatpush3.bf16.msra.mxu0 %v495_v53 }
  0x23   :  { %500 = vmatprep.subr.bf16.mxu0 %v499_v56 }
  0x26   :  { %502 = vmatpush3.bf16.msra.mxu0 %v499_v56 }
  0x92   :  { %v32_v15 = vpop.xlane.xlu0 %31 }
  0x93   :  { %v37_v16 = vmul.f32 0.03125, %v32_v15  ;;  %v239_v15 = vld [vmem:[#allocation3] sm:$0xff] }
  0x95   :  { %v39_v17 = vadd.f32 1e-06, %v37_v16 }
  0x96   :  { %v35_v18 = vpop.xlane.xlu0 %34 }
  0x97   :  { %507 = vrsqrt.f32 %v39_v17  ;;  %v38_v19 = vmul.f32 0.03125, %v35_v18 }
  0x99   :  { %v40_v20 = vadd.f32 1e-06, %v38_v19 }
  0x9b   :  { %509 = vrsqrt.f32 %v40_v20 }
  0xa1   :  { %v508_v21 = vpop.eup %507 }
  0xa2   :  { %v43_v23 = vmul.f32 %v508_v21, %v580_v0 }
  0xa4   :  { %v52_v24 = vmul.f32 %v363_v22, %v43_v23 }
  0xa5   :  { %v510_v25 = vpop.eup %509 }
  0xa6   :  { %54 = vst.msk [vmem:[#allocation2] sm:$0xff] %vm29_vm0, %v52_v24  ;;  %v44_v26 = vmul.f32 %v510_v25, %v585_v1 }
  0xa8   :  { %v53_v27 = vmul.f32 %v363_v22, %v44_v26 }
  0xaa   :  { %55 = vst.msk [vmem:[#allocation2 + $0x8] sm:$0xff] %vm29_vm0, %v53_v27 }
  0xad   :  { %v58_v28 = vld [vmem:[#allocation2] sm:$0xff] }
  0xae   :  { %406 = vmatprep.mubr.msk.f32.mxu1 %vm29_vm0, %v58_v28 }
  0xb1   :  { %v59_v32 = vld [vmem:[#allocation2 + $0x8] sm:$0xff] }
  0xb2   :  { %407 = vmatmul.mubr.msk.f32.vlgmr.msra.gmra.mrb[0].mxu1 %vm29_vm0, %v59_v32 }
  0xb3   :  { %466 = vmatpush3.bf16.msra.mxu1 %v463_v14  ;;  %417 = vmatprep.mubr.msk.f32.mxu1 %vm29_vm0, %v58_v28  ;;  %v240_v14 = vld [vmem:[#allocation3 + $0x8] sm:$0xff] }
  0xb4   :  { %468 = vmatprep.subr.bf16.mxu1 %v467_v31 }
  0xb7   :  { %470 = vmatpush3.bf16.msra.mxu1 %v467_v31 }
  0xba   :  { %418 = vmatmul.mubr.msk.f32.vlgmr.msra.gmra.mrb[2].mxu1 %vm29_vm0, %v59_v32 }
 0x185   :  { %v408_v58 = vpop.f32.mrb[0].mxu1 }
 0x186   :  { %v226_v59 = vsub.f32 0.0, %v408_v58  ;;  %v137_v60 = vpop.f32.mrb[1].mxu1 }
 0x187   :  { %v225_v61 = vsub.f32 0.0, %v137_v60 }
 0x188   :  { %v229_v62 = vmul.f32 1.442695, %v226_v59 }
 0x189   :  { %v227_v63 = vmul.f32 1.442695, %v225_v61 }
 0x18a   :  { %511 = vpow2.f32 %v229_v62 }
 0x18b   :  { %513 = vpow2.f32 %v227_v63 }
 0x18d   :  { %v419_v2 = vpop.f32.mrb[2].mxu1 }
 0x18e   :  { %v216_v3 = vpop.f32.mrb[3].mxu1 }
 0x194   :  { %v512_v4 = vpop.eup %511 }
 0x195   :  { %v514_v5 = vpop.eup %513  ;;  %v232_v6 = vadd.f32 1.0, %v512_v4 }
 0x196   :  { %v231_v7 = vadd.f32 1.0, %v514_v5 }
 0x197   :  { %515 = vrcp.f32 %v232_v6 }
 0x198   :  { %517 = vrcp.f32 %v231_v7 }
 0x1a1   :  { %v516_v8 = vpop.eup %515 }
 0x1a2   :  { %v518_v9 = vpop.eup %517  ;;  %v236_v10 = vmul.f32 %v516_v8, %v408_v58 }
 0x1a3   :  { %v235_v11 = vmul.f32 %v518_v9, %v137_v60 }
 0x1a4   :  { %v238_v12 = vmul.f32 %v419_v2, %v236_v10 }
 0x1a5   :  { %v237_v13 = vmul.f32 %v235_v11, %v216_v3 }
 0x1a7   :  { %452 = vmatprep.mubr.f32.mxu0 %v237_v13 }
 0x1a8   :  { %453 = vmatmul.mubr.f32.vlgmr.msra.gmra.mrb[0].mxu0 %v238_v12 }
 0x27b   :  { %v454_v16 = vpop.f32.mrb[0].mxu0 }
 0x27c   :  { %v333_v17 = vadd.f32 %v454_v16, %v240_v14  ;;  %v323_v18 = vpop.f32.mrb[1].mxu0 }
 0x27d   :  { %v332_v19 = vadd.f32 %v323_v18, %v239_v15 }
 0x27e   :  { %335 = vst.msk [vmem:[#allocation3 + $0x8] sm:$0xff] %vm29_vm0, %v333_v17 }
 0x27f   :  { %334 = vst.msk [vmem:[#allocation3] sm:$0xff] %vm29_vm0, %v332_v19 }
 0x285   :  { %v342_v20 = vld [vmem:[#allocation3 + $0x8] sm:$0xff] }
 0x286   :  { %v341_v21 = vld [vmem:[#allocation3] sm:$0xff]  ;;  %v344_v22 = vadd.f32 %v342_v20, %v585_v1 }
 0x287   :  { %v343_v23 = vadd.f32 %v341_v21, %v580_v0 }
 0x288   :  { %346 = vst.msk [vmem:[#allocation4 + $0x8] sm:$0xff] %vm29_vm0, %v344_v22 }
 0x289   :  { %345 = vst.msk [vmem:[#allocation4] sm:$0xff] %vm29_vm0, %v343_v23 }
 0x28a   :  { %530 = shalt.err (!%p527_p4)
}
 0x28b   :  { %s531_s18 = scalar_lea.hbm %s701_s5, 256 }
 0x28c   :  { %p532_p5 = scmp.ne.s32.totalorder %s701_s5, %s531_s18  ;;  %p535_p6 = scmp.lt.u32.totalorder %s531_s18, %s701_s5 }
 0x28e   :  { %p537_p7 = pnand %p535_p6, %p532_p5 }
 0x290   :  { %540 = shalt.err (!%p537_p7)
}
 0x291   :  { %s545_s23 = smov 128   ;;  %s546_s24 = smov 8  }
 0x292   :  { %358 = dma.vmem_to_hbm [thread:$0]  %s353_s15, 256, %s701_s5, [#allocation5], %s545_s23, %s545_s23, %s546_s24  }
 0x293   :  { %541 = dma.done.wait [#allocation5], 256  }
 0x294   :  { %542 = vsyncadd [#allocation5], 4294967040 }
 0x295   :  { %362 = vsyncpa [#allocation5], 1 }

</bundles_post_ra>
